<compile_context>
chip_gen: v7x
topology: tpu7x:2x2x1
jax: 0.10.0
libtpu: 0.0.40
codegen_flags: <defaults>
</compile_context>

<pallas_src>
import jax
import jax.numpy as jnp
from jax.experimental import pallas as pl
from jax.experimental.pallas import tpu as pltpu

# ---- fixed module hyper-parameters (from the PyTorch definition) -----------
C_IN = 216
C_OUT = 216
GROUPS = 9
CG = C_IN // GROUPS          # 24 in / 24 out channels per group
KH = KW = 3
STRIDE = 2
PAD = 1
EPS = 1e-5
KK = KH * KW * C_IN          # 1944 im2col columns (dense / block-diagonal form)
MT_MAX = 1024                # output rows per grid step (bf16 patches)


def _round_up(x, m):
    return (x + m - 1) // m * m


# ---------------------------------------------------------------------------
# Kernel: fused ReLU -> dense (block-diagonal) conv matmul -> per-tile BN
# partial statistics.  One M-tile, all 9 groups in a single MXU matmul.
#   p_ref   : (MT, 1944)  bf16 im2col patches (pre-ReLU values)
#   w_ref   : (1944, 216) bf16 block-diagonal weight (constant index -> resident)
#   y_ref   : (MT, 216)   f32 raw conv output (lane-dense store)
#   sum_ref : (1, 1, 216) per-tile channel sums
#   sq_ref  : (1, 1, 216) per-tile channel sums of squares
# ---------------------------------------------------------------------------
def relu_gconv_stats_kernel(p_ref, w_ref, y_ref, sum_ref, sq_ref):
    x = jnp.maximum(p_ref[...], 0.0)                                   # ReLU (VPU, bf16)
    y = jnp.dot(x, w_ref[...], preferred_element_type=jnp.float32)     # MXU, f32 acc
    y_ref[...] = y                                                     # lane-dense (MT,216)
    sum_ref[...] = jnp.sum(y, axis=0, keepdims=True).reshape(1, 1, C_OUT)
    sq_ref[...] = jnp.sum(y * y, axis=0, keepdims=True).reshape(1, 1, C_OUT)


# ---------------------------------------------------------------------------
# Wrapper: NCHW in -> NCHW out.
# ---------------------------------------------------------------------------
def relu_gconv_bn(x_nchw, w_oihw, gamma, beta):
    N, C, H, W = x_nchw.shape
    assert C == C_IN
    Ho = (H + 2 * PAD - KH) // STRIDE + 1
    Wo = (W + 2 * PAD - KW) // STRIDE + 1
    M = N * Ho * Wo

    # --- M tiling: big tiles, but always >= 2 grid steps (v7x dual-TC) ------
    mt = min(MT_MAX, _round_up(M, 16))
    if _round_up(M, mt) // mt < 2 and mt >= 32:
        mt = _round_up(mt // 2, 16)
    m_pad = _round_up(M, mt)
    n_mt = m_pad // mt

    # --- im2col directly in the final (M, KH*KW*C) layout, in bfloat16 ------
    # (ReLU(0) = 0, so zero padding before the in-kernel ReLU is safe; padded
    #  rows contribute 0 to the BN partial sums and are sliced off at the end.)
    x_nhwc = jnp.transpose(x_nchw, (0, 2, 3, 1))
    xp = jnp.pad(x_nhwc, ((0, 0), (PAD, PAD), (PAD, PAD), (0, 0))).astype(jnp.bfloat16)
    cols = [
        xp[:, kh:kh + STRIDE * (Ho - 1) + 1:STRIDE,
              kw:kw + STRIDE * (Wo - 1) + 1:STRIDE, :]
        for kh in range(KH) for kw in range(KW)
    ]
    patches = jnp.stack(cols, axis=3).reshape(M, KK)          # (M, 1944), cols = (kh,kw,c)
    patches = jnp.pad(patches, ((0, m_pad - M), (0, 0)))
    # TODO(synk): implicit GEMM (pass padded NHWC with memory_space=pl.ANY and
    # build the 9 shifted (kh,kw) slices in-kernel) would remove this HBM slab
    # entirely; kept in-wrapper for robustness.

    # --- grouped weight -> block-diagonal dense (1944, 216) bf16 weight ------
    w_g = w_oihw.reshape(GROUPS, CG, CG, KH, KW)              # (g, cout, cin, kh, kw)
    blocks = jnp.transpose(w_g, (3, 4, 0, 2, 1))              # (kh, kw, g, cin, cout)
    eye = jnp.eye(GROUPS, dtype=blocks.dtype)
    w_dense = jnp.einsum("hwgic,fg->hwfigc", blocks, eye)     # (kh,kw,g_in,cin,g_out,cout)
    w_dense = w_dense.reshape(KK, C_OUT).astype(jnp.bfloat16) # rows match patch cols

    # --- explicit VMEM budget from the per-step working set ------------------
    vmem_limit = int(
        2 * mt * KK * 2          # bf16 patches tile, double-buffered
        + 2 * KK * C_OUT * 2     # bf16 resident weight (double-buffered by default)
        + 2 * mt * C_OUT * 4     # f32 y tile, double-buffered
        + 8 * C_OUT * 4          # stats tiles
    ) + (8 << 20)                # compiler scratch headroom
    vmem_limit = max(vmem_limit, 16 << 20)

    # --- pass 1: ReLU + conv matmul + per-tile BN partials -------------------
    y_flat, tsum, tsq = pl.pallas_call(
        relu_gconv_stats_kernel,
        out_shape=(
            jax.ShapeDtypeStruct((m_pad, C_OUT), jnp.float32),
            jax.ShapeDtypeStruct((n_mt, 1, C_OUT), jnp.float32),
            jax.ShapeDtypeStruct((n_mt, 1, C_OUT), jnp.float32),
        ),
        grid_spec=pltpu.PrefetchScalarGridSpec(
            num_scalar_prefetch=0,
            grid=(n_mt,),
            in_specs=[
                pl.BlockSpec((mt, KK), lambda m: (m, 0)),
                pl.BlockSpec((KK, C_OUT), lambda m: (0, 0)),       # resident weight
            ],
            out_specs=[
                pl.BlockSpec((mt, C_OUT), lambda m: (m, 0)),       # lane-dense raw y
                pl.BlockSpec((1, 1, C_OUT), lambda m: (m, 0, 0)),  # per-tile sums
                pl.BlockSpec((1, 1, C_OUT), lambda m: (m, 0, 0)),  # per-tile sums of sq
            ],
        ),
        compiler_params=pltpu.CompilerParams(
            dimension_semantics=("parallel",),
            vmem_limit_bytes=vmem_limit),
    )(patches, w_dense)

    # --- finalize batch statistics (216 channels; negligible JAX work) -------
    tot = jnp.sum(tsum[:, 0, :], axis=0)
    tot_sq = jnp.sum(tsq[:, 0, :], axis=0)
    mean = tot / M
    var = jnp.maximum(tot_sq / M - mean * mean, 0.0)          # biased variance (BN norm)
    # TODO(synk): E[y^2]-E[y]^2 in f32 can lose precision for large-mean/small-var
    # channels at very large M; switch to centered (Chan-combined) partials if needed.
    inv = jax.lax.rsqrt(var + EPS)
    scale = (gamma * inv).reshape(1, C_OUT)
    shift = (beta - mean * gamma * inv).reshape(1, C_OUT)
    # TODO(synk): BatchNorm2d running_mean / running_var (momentum=0.1) training-mode
    # state updates are not materialized; only x44 is returned.

    # --- BN affine applied in plain JAX: XLA fuses it into the NHWC->NCHW
    # transpose that already traverses the whole output (no second pallas_call).
    # TODO(synk): y_flat could be stored bf16 to halve this last intermediate's
    # traffic; kept f32 to carry full conv precision into the normalization.
    out = (y_flat[:M] * scale + shift).reshape(N, Ho, Wo, C_OUT)
    return jnp.transpose(out, (0, 3, 1, 2))                   # NHWC -> NCHW


# ---------------------------------------------------------------------------
# Pure-JAX f32 reference (same semantics) for a correctness check.
# ---------------------------------------------------------------------------
def reference(x_nchw, w_oihw, gamma, beta):
    xr = jnp.maximum(x_nchw, 0.0)
    conv = jax.lax.conv_general_dilated(
        xr, w_oihw,
        window_strides=(STRIDE, STRIDE),
        padding=((PAD, PAD), (PAD, PAD)),
        dimension_numbers=("NCHW", "OIHW", "NCHW"),
        feature_group_count=GROUPS,
    )
    mean = conv.mean(axis=(0, 2, 3), keepdims=True)
    var = jnp.square(conv - mean).mean(axis=(0, 2, 3), keepdims=True)
    g = gamma.reshape(1, -1, 1, 1)
    b = beta.reshape(1, -1, 1, 1)
    return (conv - mean) * jax.lax.rsqrt(var + EPS) * g + b


if __name__ == "__main__":
    # Small, module-consistent shapes: channels fixed at 216 (9 groups of 24),
    # reduced batch / spatial: (2, 216, 16, 16) -> output (2, 216, 8, 8).
    key = jax.random.PRNGKey(0)
    kx, kw, kg, kb = jax.random.split(key, 4)

    x = jax.random.normal(kx, (2, C_IN, 16, 16), dtype=jnp.float32)
    # Deterministic synthetic parameters (no checkpoint).
    w = 0.1 * jax.random.normal(kw, (C_OUT, C_IN // GROUPS, KH, KW), dtype=jnp.float32)
    gamma = 1.0 + 0.1 * jax.random.normal(kg, (C_OUT,), dtype=jnp.float32)
    beta = 0.1 * jax.random.normal(kb, (C_OUT,), dtype=jnp.float32)

    out = jax.jit(relu_gconv_bn)(x, w, gamma, beta)
    out = jax.block_until_ready(out)

    ref = reference(x, w, gamma, beta)
    assert out.shape == ref.shape == (2, C_OUT, 8, 8)
    # Tolerance accounts for bf16 conv inputs (f32 accumulation / f32 BN stats).
    assert jnp.allclose(out, ref, rtol=2e-2, atol=2e-2), float(jnp.max(jnp.abs(out - ref)))

    print("KERNEL_OK")
</pallas_src>

<mosaic_0001>
module attributes {stable_mosaic.version = 11 : i64} {
  func.func @relu_gconv_stats_kernel(%arg0: i32, %arg1: memref<64x1944xbf16, #tpu.memory_space<vmem>>, %arg2: memref<1944x216xbf16, #tpu.memory_space<vmem>>, %arg3: memref<64x216xf32, #tpu.memory_space<vmem>>, %arg4: memref<1x1x216xf32, #tpu.memory_space<vmem>>, %arg5: memref<1x1x216xf32, #tpu.memory_space<vmem>>) attributes {dimension_semantics = [#tpu.dimension_semantics<parallel>], iteration_bounds = array<i64: 2>, scalar_prefetch = 0 : i64, scratch_operands = 0 : i64, tpu.core_type = #tpu.core_type<tc>, window_params = [{transform_indices = @transform_0, window_bounds = array<i64: 64, 1944>}, {pipeline_mode = #tpu.pipeline_mode<synchronous>, transform_indices = @transform_1, window_bounds = array<i64: 1944, 216>}, {transform_indices = @transform_2, window_bounds = array<i64: 64, 216>}, {transform_indices = @transform_3, window_bounds = array<i64: 1, 1, 216>}, {transform_indices = @transform_4, window_bounds = array<i64: 1, 1, 216>}]} {
    %c0 = arith.constant 0 : index
    %c0_0 = arith.constant 0 : index
    %0 = vector.load %arg1[%c0, %c0_0] : memref<64x1944xbf16, #tpu.memory_space<vmem>>, vector<64x1944xbf16>
    %cst = arith.constant 0.000000e+00 : bf16
    %1 = vector.broadcast %cst : bf16 to vector<64x1944xbf16>
    %2 = arith.maximumf %0, %1 : vector<64x1944xbf16>
    %c0_1 = arith.constant 0 : index
    %c0_2 = arith.constant 0 : index
    %3 = vector.load %arg2[%c0_1, %c0_2] : memref<1944x216xbf16, #tpu.memory_space<vmem>>, vector<1944x216xbf16>
    %cst_3 = arith.constant dense<0.000000e+00> : vector<64x216xf32>
    %4 = tpu.matmul %2, %3, %cst_3 {dimension_numbers = #tpu.dot_dimension_numbers<[1], [0], [0], [1], [0, 0, 1, 1], [], []>} : vector<64x1944xbf16>, vector<1944x216xbf16>, vector<64x216xf32> -> vector<64x216xf32>
    %c0_4 = arith.constant 0 : index
    %c0_5 = arith.constant 0 : index
    %5 = vector.load %arg3[%c0_4, %c0_5] : memref<64x216xf32, #tpu.memory_space<vmem>>, vector<64x216xf32>
    tpu.vector_store %arg3[%c0_4, %c0_5], %4 {strides = array<i32>} : memref<64x216xf32, #tpu.memory_space<vmem>>, vector<64x216xf32>,
    %cst_6 = arith.constant dense<0.000000e+00> : vector<216xf32>
    %6 = vector.multi_reduction <add>, %4, %cst_6 [0] : vector<64x216xf32> to vector<216xf32>
    %7 = vector.shape_cast %6 : vector<216xf32> to vector<1x216xf32>
    %8 = vector.shape_cast %7 : vector<1x216xf32> to vector<1x1x216xf32>
    %c0_7 = arith.constant 0 : index
    %c0_8 = arith.constant 0 : index
    %c0_9 = arith.constant 0 : index
    %9 = vector.load %arg4[%c0_7, %c0_8, %c0_9] : memref<1x1x216xf32, #tpu.memory_space<vmem>>, vector<1x1x216xf32>
    tpu.vector_store %arg4[%c0_7, %c0_8, %c0_9], %8 {strides = array<i32>} : memref<1x1x216xf32, #tpu.memory_space<vmem>>, vector<1x1x216xf32>,
    %10 = arith.mulf %4, %4 : vector<64x216xf32>
    %cst_10 = arith.constant dense<0.000000e+00> : vector<216xf32>
    %11 = vector.multi_reduction <add>, %10, %cst_10 [0] : vector<64x216xf32> to vector<216xf32>
    %12 = vector.shape_cast %11 : vector<216xf32> to vector<1x216xf32>
    %13 = vector.shape_cast %12 : vector<1x216xf32> to vector<1x1x216xf32>
    %c0_11 = arith.constant 0 : index
    %c0_12 = arith.constant 0 : index
    %c0_13 = arith.constant 0 : index
    %14 = vector.load %arg5[%c0_11, %c0_12, %c0_13] : memref<1x1x216xf32, #tpu.memory_space<vmem>>, vector<1x1x216xf32>
    tpu.vector_store %arg5[%c0_11, %c0_12, %c0_13], %13 {strides = array<i32>} : memref<1x1x216xf32, #tpu.memory_space<vmem>>, vector<1x1x216xf32>,
    return
  }
  func.func @transform_0(%arg0: i32) -> (i32, i32) {
    %c0_i32 = arith.constant 0 : i32
    %c0_i32_0 = arith.constant 0 : i32
    return %arg0, %c0_i32 : i32, i32
  }
  func.func @transform_1(%arg0: i32) -> (i32, i32) {
    %c0_i32 = arith.constant 0 : i32
    %c0_i32_0 = arith.constant 0 : i32
    %c0_i32_1 = arith.constant 0 : i32
    return %c0_i32, %c0_i32_0 : i32, i32
  }
  func.func @transform_2(%arg0: i32) -> (i32, i32) {
    %c0_i32 = arith.constant 0 : i32
    %c0_i32_0 = arith.constant 0 : i32
    return %arg0, %c0_i32 : i32, i32
  }
  func.func @transform_3(%arg0: i32) -> (i32, i32, i32) {
    %c0_i32 = arith.constant 0 : i32
    %c0_i32_0 = arith.constant 0 : i32
    %c0_i32_1 = arith.constant 0 : i32
    return %arg0, %c0_i32, %c0_i32_0 : i32, i32, i32
  }
  func.func @transform_4(%arg0: i32) -> (i32, i32, i32) {
    %c0_i32 = arith.constant 0 : i32
    %c0_i32_0 = arith.constant 0 : i32
    %c0_i32_1 = arith.constant 0 : i32
    return %arg0, %c0_i32, %c0_i32_0 : i32, i32, i32
  }
}

</mosaic_0001>

<bundles_post_ra>
// kernel: relu_gconv_bn.1
= control target key start
LH: loop header
LB: loop body
LE: loop exit
PB: predicated region body
PF: predicated region fallthrough
CT: control target
= control target key end

     0   :  { %s3849_s15 = smov 0   ;;  %s4850_s0 = inlined_call_operand.vmem [shape: bf16[128,1944], index: 0, kind: input, shape index: {}]   ;;  %s4851_s1 = inlined_call_operand.vmem [shape: bf16[1944,216], index: 1, kind: input, shape index: {}]   ;;  %s4852_s2 = inlined_call_operand.vmem [shape: f32[128,216], index: 2, kind: output, shape index: {0}]   ;;  %s4853_s3 = inlined_call_operand.vmem [shape: f32[2,1,216], index: 3, kind: output, shape index: {1}]   ;;  %s4854_s4 = inlined_call_operand.vmem [shape: f32[2,1,216], index: 4, kind: output, shape index: {2}]  }
   0x1 LB: > { %s3855_s16 = sadd.s32 4294967295, %s3820_s15   ;;  %p3001_p0 = scmp.ge.s32.totalorder %s3820_s15, 1  ;;  %s3820_s15 = sphi %s3849_s15, %s15_s15  }
   0x2   : > { %p169_p1 = scmp.lt.s32.totalorder %s3820_s15, 3 }
   0x4   : > { %p170_p2 = pnand %p3001_p0, %p169_p1 }
   0x5   : > { %v3449_v0 = vld [vmem:[%s4851_s1 + $0x4] ss:$8 sps:$4 sm:$0xff] (!%p170_p2)   ;;  %v3453_v2 = vld [vmem:[%s4851_s1] ss:$8 sps:$4 sm:$0xff] (!%p170_p2)   ;;  %v3455_v4 = vld [vmem:[%s4851_s1 + $0x14] ss:$8 sps:$4 sm:$0xff] (!%p170_p2)  }
   0x6   : > { %173 = sbr.rel (%p170_p2) target bundleno = 527 (0x20f), region = 28  ;;  %v3451_v1 = vld [vmem:[%s4851_s1 + $0x404] ss:$8 sps:$4 sm:$0xff] (!%p170_p2)   ;;  %2150 = vmatprep.subr.bf16.mxu1 (!%p170_p2), %v3449_v0  ;;  %v3454_v3 = vld [vmem:[%s4851_s1 + $0x400] ss:$8 sps:$4 sm:$0xff] (!%p170_p2)   ;;  %s3002_s29 = sshll.u32 (!%p170_p2), %s3855_s16, 3 }
   0x7   : > { %2442 = vmatprep.subr.bf16.mxu0 (!%p170_p2), %v3451_v1  ;;  %2151 = vmatpush1.bf16.msra.mxu1 (!%p170_p2), %v3453_v2  ;;  %v3457_v5 = vld [vmem:[%s4851_s1 + $0x414] ss:$8 sps:$4 sm:$0xff] (!%p170_p2)   ;;  %v3459_v6 = vld [vmem:[%s4851_s1 + $0x10] ss:$8 sps:$4 sm:$0xff] (!%p170_p2)   ;;  %v3461_v8 = vld [vmem:[%s4851_s1 + $0x24] ss:$8 sps:$4 sm:$0xff] (!%p170_p2)  }
   0x8   : > { %2443 = vmatpush1.bf16.msra.mxu0 (!%p170_p2), %v3454_v3  ;;  %2152 = vmatprep.subr.bf16.mxu1 (!%p170_p2), %v3455_v4  ;;  %v3460_v7 = vld [vmem:[%s4851_s1 + $0x410] ss:$8 sps:$4 sm:$0xff] (!%p170_p2)   ;;  %v3463_v9 = vld [vmem:[%s4851_s1 + $0x424] ss:$8 sps:$4 sm:$0xff] (!%p170_p2)   ;;  %v3465_v10 = vld [vmem:[%s4851_s1 + $0x20] ss:$8 sps:$4 sm:$0xff] (!%p170_p2)  }
   0x9   : > { %2444 = vmatprep.subr.bf16.mxu0 (!%p170_p2), %v3457_v5  ;;  %v3466_v11 = vld [vmem:[%s4851_s1 + $0x420] ss:$8 sps:$4 sm:$0xff] (!%p170_p2)   ;;  %v3467_v12 = vld [vmem:[%s4851_s1 + $0x34] ss:$8 sps:$4 sm:$0xff] (!%p170_p2)   ;;  %v3471_v14 = vld [vmem:[%s4851_s1 + $0x30] ss:$8 sps:$4 sm:$0xff] (!%p170_p2)  }
   0xa   : > { %v3469_v13 = vld [vmem:[%s4851_s1 + $0x434] ss:$8 sps:$4 sm:$0xff] (!%p170_p2)   ;;  %v3472_v15 = vld [vmem:[%s4851_s1 + $0x430] ss:$8 sps:$4 sm:$0xff] (!%p170_p2)   ;;  %v3473_v16 = vld [vmem:[%s4851_s1 + $0x44] ss:$8 sps:$4 sm:$0xff] (!%p170_p2)  }
   0xb   : > { %2153 = vmatpush1.bf16.msra.mxu1 (!%p170_p2), %v3459_v6  ;;  %v3475_v17 = vld [vmem:[%s4851_s1 + $0x444] ss:$8 sps:$4 sm:$0xff] (!%p170_p2)   ;;  %v3477_v18 = vld [vmem:[%s4851_s1 + $0x40] ss:$8 sps:$4 sm:$0xff] (!%p170_p2)   ;;  %v3479_v20 = vld [vmem:[%s4851_s1 + $0x54] ss:$8 sps:$4 sm:$0xff] (!%p170_p2)  }
   0xc   : > { %2445 = vmatpush1.bf16.msra.mxu0 (!%p170_p2), %v3460_v7  ;;  %2154 = vmatprep.subr.bf16.mxu1 (!%p170_p2), %v3461_v8  ;;  %v3478_v19 = vld [vmem:[%s4851_s1 + $0x440] ss:$8 sps:$4 sm:$0xff] (!%p170_p2)   ;;  %v3481_v21 = vld [vmem:[%s4851_s1 + $0x454] ss:$8 sps:$4 sm:$0xff] (!%p170_p2)   ;;  %v3483_v22 = vld [vmem:[%s4851_s1 + $0x50] ss:$8 sps:$4 sm:$0xff] (!%p170_p2)  }
   0xd   : > { %2446 = vmatprep.subr.bf16.mxu0 %v3463_v9  ;;  %v3484_v23 = vld [vmem:[%s4851_s1 + $0x450] ss:$8 sps:$4 sm:$0xff]   ;;  %v3485_v24 = vld [vmem:[%s4851_s1 + $0x64] ss:$8 sps:$4 sm:$0xff]   ;;  %v3489_v26 = vld [vmem:[%s4851_s1 + $0x60] ss:$8 sps:$4 sm:$0xff]  }
   0xe   : > { %v3487_v25 = vld [vmem:[%s4851_s1 + $0x464] ss:$8 sps:$4 sm:$0xff]   ;;  %v3490_v27 = vld [vmem:[%s4851_s1 + $0x460] ss:$8 sps:$4 sm:$0xff]   ;;  %v3491_v28 = vld [vmem:[%s4851_s1 + $0x74] ss:$8 sps:$4 sm:$0xff]  }
   0xf   : > { %2155 = vmatpush1.bf16.msra.mxu1 %v3465_v10  ;;  %v3493_v29 = vld [vmem:[%s4851_s1 + $0x474] ss:$8 sps:$4 sm:$0xff]   ;;  %v3495_v30 = vld [vmem:[%s4851_s1 + $0x70] ss:$8 sps:$4 sm:$0xff]   ;;  %v3497_v32 = vld [vmem:[%s4851_s1 + $0x84] ss:$8 sps:$4 sm:$0xff]  }
  0x10   : > { %2447 = vmatpush1.bf16.msra.mxu0 %v3466_v11  ;;  %2156 = vmatprep.subr.bf16.mxu1 %v3467_v12  ;;  %v3496_v31 = vld [vmem:[%s4851_s1 + $0x470] ss:$8 sps:$4 sm:$0xff]   ;;  %p206_p3 = scmp.lt.s32.totalorder %s3002_s29, 15  ;;  %v3499_v33 = vld [vmem:[%s4851_s1 + $0x484] ss:$8 sps:$4 sm:$0xff]   ;;  %v3822_v50 = vmov 0  }
  0x11   : > { %2448 = vmatprep.subr.bf16.mxu0 %v3469_v13  ;;  %v3501_v34 = vld [vmem:[%s4851_s1 + $0x80] ss:$8 sps:$4 sm:$0xff]   ;;  %v3503_v36 = vld [vmem:[%s4851_s1 + $0x94] ss:$8 sps:$4 sm:$0xff]   ;;  %v3507_v38 = vld [vmem:[%s4851_s1 + $0x90] ss:$8 sps:$4 sm:$0xff]  }
  0x12   : > { %v3502_v35 = vld [vmem:[%s4851_s1 + $0x480] ss:$8 sps:$4 sm:$0xff]   ;;  %s4856_s29 = smov (!%p206_p3, %s3002_s29), 15  ;;  %v3505_v37 = vld [vmem:[%s4851_s1 + $0x494] ss:$8 sps:$4 sm:$0xff]   ;;  %vm2130_vm0 = vcmask 195584  }
  0x13   : > { %2157 = vmatpush1.bf16.msra.mxu1 %v3471_v14  ;;  %v3508_v39 = vld [vmem:[%s4851_s1 + $0x490] ss:$8 sps:$4 sm:$0xff]   ;;  %v3509_v40 = vld [vmem:[%s4851_s1 + $0xa4] ss:$8 sps:$4 sm:$0xff]   ;;  %s3325_s28 = sshll.u32 %s4856_s29, 6  ;;  %vm2143_vm1 = vcmask 1043456  }
  0x14   : > { %2449 = vmatpush1.bf16.msra.mxu0 %v3472_v15  ;;  %2158 = vmatprep.subr.bf16.mxu1 %v3473_v16  ;;  %v3511_v41 = vld [vmem:[%s4851_s1 + $0x4a4] ss:$8 sps:$4 sm:$0xff]   ;;  %v3513_v42 = vld [vmem:[%s4851_s1 + $0xa0] ss:$8 sps:$4 sm:$0xff]   ;;  %s3998_s12 = scalar_lea.vmem %s4850_s0, %s3325_s28  ;;  %v3515_v44 = vld [vmem:[%s4851_s1 + $0xb4] ss:$8 sps:$4 sm:$0xff]  }
  0x15   : > { %2450 = vmatprep.subr.bf16.mxu0 %v3475_v17  ;;  %v3514_v43 = vld [vmem:[%s4851_s1 + $0x4a0] ss:$8 sps:$4 sm:$0xff]   ;;  %v3517_v45 = vld [vmem:[%s4851_s1 + $0x4b4] ss:$8 sps:$4 sm:$0xff]   ;;  %v3519_v46 = vld [vmem:[%s4851_s1 + $0xb0] ss:$8 sps:$4 sm:$0xff]  }
  0x16   : > { %v3520_v47 = vld [vmem:[%s4851_s1 + $0x4b0] ss:$8 sps:$4 sm:$0xff]   ;;  %v228_v48 = vld [vmem:[%s3998_s12] sm:$0xff]  ;;  %v3527_v62 = vld [vmem:[%s4851_s1 + $0xd4] ss:$8 sps:$4 sm:$0xff]   ;;  %vm2735_vm2 = vcmask 719872  }
  0x17   : > { %2159 = vmatpush1.bf16.msra.mxu1 %v3477_v18  ;;  %v236_v49 = vld [vmem:[%s3998_s12 + $0x40] sm:$0xff]  ;;  %v292_v51 = vmax.bf16 %v3822_v50, %v228_v48  ;;  %v3529_v0 = vld [vmem:[%s4851_s1 + $0x4d4] ss:$8 sps:$4 sm:$0xff]   ;;  %v3531_v1 = vld [vmem:[%s4851_s1 + $0xd0] ss:$8 sps:$4 sm:$0xff]   ;;  %p219_p4 = scmp.lt.s32.totalorder %s3855_s16, 1 }
  0x18   : > { %2451 = vmatpush1.bf16.msra.mxu0 %v3478_v19  ;;  %2160 = vmatprep.subr.bf16.mxu1 %v3479_v20  ;;  %v3521_v52 = vld [vmem:[%s4851_s1 + $0xc4] ss:$8 sps:$4 sm:$0xff]   ;;  %v300_v54 = vmax.bf16 %v3822_v50, %v236_v49  ;;  %v3525_v60 = vld [vmem:[%s4851_s1 + $0xc0] ss:$8 sps:$4 sm:$0xff]   ;;  %v3532_v2 = vld [vmem:[%s4851_s1 + $0x4d0] ss:$8 sps:$4 sm:$0xff]  }
  0x19   : > { %2452 = vmatprep.subr.bf16.mxu0 %v3481_v21  ;;  %v3523_v53 = vld [vmem:[%s4851_s1 + $0x4c4] ss:$8 sps:$4 sm:$0xff]   ;;  %v3526_v61 = vld [vmem:[%s4851_s1 + $0x4c0] ss:$8 sps:$4 sm:$0xff]   ;;  %v3539_v7 = vld [vmem:[%s4851_s1 + $0xf4] ss:$8 sps:$4 sm:$0xff]  }
  0x1a   : > { %v232_v55 = vld [vmem:[%s3998_s12 + $0x20] sm:$0xff]  ;;  %v3011_v58 = vcombine.high %v292_v51, %v300_v54  ;;  %v3541_v8 = vld [vmem:[%s4851_s1 + $0x4f4] ss:$8 sps:$4 sm:$0xff]   ;;  %v3543_v9 = vld [vmem:[%s4851_s1 + $0xf0] ss:$8 sps:$4 sm:$0xff]   ;;  %v3010_v15 = vcombine.low %v292_v51, %v300_v54  ;;  %s4858_s16 = smov (!%p219_p4, %s3855_s16), 1 }
  0x1b   : > { %2161 = vmatpush1.bf16.msra.mxu1 %v3483_v22  ;;  %v240_v56 = vld [vmem:[%s3998_s12 + $0x60] sm:$0xff]  ;;  %v296_v57 = vmax.bf16 %v3822_v50, %v232_v55  ;;  %v3544_v10 = vld [vmem:[%s4851_s1 + $0x4f0] ss:$8 sps:$4 sm:$0xff]   ;;  %v3553_v17 = vld [vmem:[%s4851_s1 + $0x114] ss:$8 sps:$4 sm:$0xff]  }
  0x1c   : > { %2453 = vmatpush1.bf16.msra.mxu0 %v3484_v23  ;;  %2162 = vmatprep.subr.bf16.mxu1 %v3485_v24  ;;  %v304_v59 = vmax.bf16 %v3822_v50, %v240_v56  ;;  %v3533_v3 = vld [vmem:[%s4851_s1 + $0xe4] ss:$8 sps:$4 sm:$0xff]   ;;  %v3537_v5 = vld [vmem:[%s4851_s1 + $0xe0] ss:$8 sps:$4 sm:$0xff]   ;;  %v3556_v18 = vld [vmem:[%s4851_s1 + $0x514] ss:$8 sps:$4 sm:$0xff]  }
  0x1d   : > { %2454 = vmatprep.subr.bf16.mxu0 %v3487_v25  ;;  %2182 = vmatprep.mubr.bf16.mxu1 %v3011_v58  ;;  %v3535_v4 = vld [vmem:[%s4851_s1 + $0x4e4] ss:$8 sps:$4 sm:$0xff]   ;;  %v3538_v6 = vld [vmem:[%s4851_s1 + $0x4e0] ss:$8 sps:$4 sm:$0xff]   ;;  %v3551_v19 = vld [vmem:[%s4851_s1 + $0x110] ss:$8 sps:$4 sm:$0xff]  }
  0x1e   : > { %v3019_v63 = vcombine.high %v296_v57, %v304_v59  ;;  %v3547_v11 = vld [vmem:[%s4851_s1 + $0x104] ss:$8 sps:$4 sm:$0xff]   ;;  %v3545_v13 = vld [vmem:[%s4851_s1 + $0x100] ss:$8 sps:$4 sm:$0xff]   ;;  %v3018_v16 = vcombine.low %v296_v57, %v304_v59  ;;  %v3554_v20 = vld [vmem:[%s4851_s1 + $0x510] ss:$8 sps:$4 sm:$0xff]  }
  0x1f   : > { %2163 = vmatpush1.bf16.msra.mxu1 %v3489_v26  ;;  %v3550_v12 = vld [vmem:[%s4851_s1 + $0x504] ss:$8 sps:$4 sm:$0xff]   ;;  %v3548_v14 = vld [vmem:[%s4851_s1 + $0x500] ss:$8 sps:$4 sm:$0xff]   ;;  %v3580_v56 = vld [vmem:[%s4851_s1 + $0x554] ss:$8 sps:$4 sm:$0xff]  }
  0x20   : > { %2455 = vmatpush1.bf16.msra.mxu0 %v3490_v27  ;;  %2164 = vmatprep.subr.bf16.mxu1 %v3491_v28  ;;  %v3559_v21 = vld [vmem:[%s4851_s1 + $0x124] ss:$8 sps:$4 sm:$0xff]   ;;  %v3557_v23 = vld [vmem:[%s4851_s1 + $0x120] ss:$8 sps:$4 sm:$0xff]   ;;  %v3565_v28 = vld [vmem:[%s4851_s1 + $0x134] ss:$8 sps:$4 sm:$0xff]  }
  0x21   : > { %2456 = vmatprep.subr.bf16.mxu0 %v3493_v29  ;;  %2474 = vmatprep.mubr.bf16.mxu0 %v3019_v63  ;;  %v3562_v22 = vld [vmem:[%s4851_s1 + $0x524] ss:$8 sps:$4 sm:$0xff]   ;;  %v3560_v24 = vld [vmem:[%s4851_s1 + $0x520] ss:$8 sps:$4 sm:$0xff]   ;;  %v3568_v29 = vld [vmem:[%s4851_s1 + $0x534] ss:$8 sps:$4 sm:$0xff]  }
  0x22   : > { %v244_v25 = vld [vmem:[%s3998_s12 + $0x80] sm:$0xff]  ;;  %v3575_v58 = vld [vmem:[%s4851_s1 + $0x150] ss:$8 sps:$4 sm:$0xff]  }
  0x23   : > { %2165 = vmatpush1.bf16.msra.mxu1 %v3495_v30  ;;  %v252_v26 = vld [vmem:[%s3998_s12 + $0xc0] sm:$0xff]  ;;  %v308_v27 = vmax.bf16 %v3822_v50, %v244_v25  ;;  %v3578_v59 = vld [vmem:[%s4851_s1 + $0x550] ss:$8 sps:$4 sm:$0xff]   ;;  %v241_v25 = vld [vmem:[%s3998_s12 + $0x68] sm:$0xff] }
  0x24   : > { %2457 = vmatpush1.bf16.msra.mxu0 %v3496_v31  ;;  %2166 = vmatprep.subr.bf16.mxu1 %v3497_v32  ;;  %v316_v30 = vmax.bf16 %v3822_v50, %v252_v26  ;;  %v248_v31 = vld [vmem:[%s3998_s12 + $0xa0] sm:$0xff] }
  0x25   : > { %2458 = vmatprep.subr.bf16.mxu0 %v3499_v33  ;;  %v256_v32 = vld [vmem:[%s3998_s12 + $0xe0] sm:$0xff]  ;;  %v312_v33 = vmax.bf16 %v3822_v50, %v248_v31  ;;  %v3601_v31 = vld [vmem:[%s4851_s1 + $0x194] ss:$8 sps:$4 sm:$0xff]  }
  0x26   : > { %v3572_v48 = vld [vmem:[%s4851_s1 + $0x540] ss:$8 sps:$4 sm:$0xff]  }
  0x27   : > { %2167 = vmatpush1.bf16.msra.mxu1 %v3501_v34  ;;  %v3027_v34 = vcombine.high %v308_v27, %v316_v30  ;;  %v264_v49 = vld [vmem:[%s3998_s12 + $0x120] sm:$0xff] }
  0x28   : > { %2459 = vmatpush1.bf16.msra.mxu0 %v3502_v35  ;;  %2168 = vmatprep.subr.bf16.mxu1 %v3503_v36  ;;  %v320_v35 = vmax.bf16 %v3822_v50, %v256_v32  ;;  %v3563_v36 = vld [vmem:[%s4851_s1 + $0x130] ss:$8 sps:$4 sm:$0xff]   ;;  %v272_v51 = vld [vmem:[%s3998_s12 + $0x160] sm:$0xff]  ;;  %v328_v54 = vmax.bf16 %v3822_v50, %v264_v49  ;;  %v3628_v49 = vld [vmem:[%s4851_s1 + $0x5d4] ss:$8 sps:$4 sm:$0xff]  }
  0x29   : > { %2460 = vmatprep.subr.bf16.mxu0 %v3505_v37  ;;  %v3566_v37 = vld [vmem:[%s4851_s1 + $0x530] ss:$8 sps:$4 sm:$0xff]   ;;  %v336_v55 = vmax.bf16 %v3822_v50, %v272_v51  ;;  %v284_v63 = vld [vmem:[%s3998_s12 + $0x1c0] sm:$0xff] }
  0x2a   : > { %v3623_v51 = vld [vmem:[%s4851_s1 + $0x1d0] ss:$8 sps:$4 sm:$0xff]  }
  0x2b   : > { %2169 = vmatpush1.bf16.msra.mxu1 %v3507_v38  ;;  %v3026_v38 = vcombine.low %v308_v27, %v316_v30  ;;  %v3051_v57 = vcombine.high %v328_v54, %v336_v55  ;;  %v3596_v30 = vld [vmem:[%s4851_s1 + $0x580] ss:$8 sps:$4 sm:$0xff]  }
  0x2c   : > { %2461 = vmatpush1.bf16.msra.mxu0 %v3508_v39  ;;  %2170 = vmatprep.subr.bf16.mxu1 %v3509_v40  ;;  %v3571_v39 = vld [vmem:[%s4851_s1 + $0x144] ss:$8 sps:$4 sm:$0xff]   ;;  %v3035_v40 = vcombine.high %v312_v33, %v320_v35 }
  0x2d   : > { %2462 = vmatprep.subr.bf16.mxu0 %v3511_v41  ;;  %v3034_v41 = vcombine.low %v312_v33, %v320_v35  ;;  %v3604_v33 = vld [vmem:[%s4851_s1 + $0x594] ss:$8 sps:$4 sm:$0xff]   ;;  %v3602_v35 = vld [vmem:[%s4851_s1 + $0x590] ss:$8 sps:$4 sm:$0xff]  }
  0x2f   : > { %2171 = vmatpush1.bf16.msra.mxu1 %v3513_v42  ;;  %v3574_v42 = vld [vmem:[%s4851_s1 + $0x544] ss:$8 sps:$4 sm:$0xff]  }
  0x30   : > { %2463 = vmatpush1.bf16.msra.mxu0 %v3514_v43  ;;  %2172 = vmatprep.subr.bf16.mxu1 %v3515_v44  ;;  %v260_v43 = vld [vmem:[%s3998_s12 + $0x100] sm:$0xff] }
  0x31   : > { %2464 = vmatprep.subr.bf16.mxu0 %v3517_v45  ;;  %v268_v44 = vld [vmem:[%s3998_s12 + $0x140] sm:$0xff] }
  0x32   : > { %v3569_v45 = vld [vmem:[%s4851_s1 + $0x140] ss:$8 sps:$4 sm:$0xff]  }
  0x33   : > { %2173 = vmatpush1.bf16.msra.mxu1 %v3519_v46  ;;  %v324_v46 = vmax.bf16 %v3822_v50, %v260_v43  ;;  %v3614_v43 = vld [vmem:[%s4851_s1 + $0x5b0] ss:$8 sps:$4 sm:$0xff]  }
  0x34   : > { %2465 = vmatpush1.bf16.msra.mxu0 %v3520_v47  ;;  %2174 = vmatprep.subr.bf16.mxu1 %v3521_v52  ;;  %v332_v47 = vmax.bf16 %v3822_v50, %v268_v44  ;;  %v3577_v52 = vld [vmem:[%s4851_s1 + $0x154] ss:$8 sps:$4 sm:$0xff]   ;;  %v3619_v44 = vld [vmem:[%s4851_s1 + $0x1c4] ss:$8 sps:$4 sm:$0xff]  }
  0x35   : > { %2466 = vmatprep.subr.bf16.mxu0 %v3523_v53 }
  0x36   : > { %v3043_v53 = vcombine.high %v324_v46, %v332_v47 }
  0x37   : > { %2175 = vmatpush1.bf16.msra.mxu1 %v3525_v60  ;;  %v3042_v60 = vcombine.low %v324_v46, %v332_v47  ;;  %v3617_v46 = vld [vmem:[%s4851_s1 + $0x1c0] ss:$8 sps:$4 sm:$0xff]  }
  0x38   : > { %2467 = vmatpush1.bf16.msra.mxu0 %v3526_v61  ;;  %2176 = vmatprep.subr.bf16.mxu1 %v3527_v62  ;;  %v3050_v61 = vcombine.low %v328_v54, %v336_v55  ;;  %v276_v62 = vld [vmem:[%s3998_s12 + $0x180] sm:$0xff] }
  0x39   : > { %2468 = vmatprep.subr.bf16.mxu0 %v3529_v0  ;;  %v3583_v0 = vld [vmem:[%s4851_s1 + $0x164] ss:$8 sps:$4 sm:$0xff]   ;;  %v3620_v47 = vld [vmem:[%s4851_s1 + $0x5c0] ss:$8 sps:$4 sm:$0xff]  }
  0x3a   : > { %v3634_v54 = vld [vmem:[%s4851_s1 + $0x5e4] ss:$8 sps:$4 sm:$0xff]   ;;  %v3629_v55 = vld [vmem:[%s4851_s1 + $0x1e0] ss:$8 sps:$4 sm:$0xff]  }
  0x3b   : > { %2177 = vmatpush1.bf16.msra.mxu1 %v3531_v1  ;;  %v3586_v1 = vld [vmem:[%s4851_s1 + $0x564] ss:$8 sps:$4 sm:$0xff]  }
  0x3c   : > { %2469 = vmatpush1.bf16.msra.mxu0 %v3532_v2  ;;  %2178 = vmatprep.subr.bf16.mxu1 %v3533_v3  ;;  %v340_v2 = vmax.bf16 %v3822_v50, %v276_v62  ;;  %v348_v3 = vmax.bf16 %v3822_v50, %v284_v63  ;;  %v249_v62 = vld [vmem:[%s3998_s12 + $0xa8] sm:$0xff] }
  0x3d   : > { %2470 = vmatprep.subr.bf16.mxu0 %v3535_v4  ;;  %v280_v4 = vld [vmem:[%s3998_s12 + $0x1a0] sm:$0xff]  ;;  %v257_v63 = vld [vmem:[%s3998_s12 + $0xe8] sm:$0xff] }
  0x3f   : > { %2179 = vmatpush1.bf16.msra.mxu1 %v3537_v5  ;;  %v288_v5 = vld [vmem:[%s3998_s12 + $0x1e0] sm:$0xff] }
  0x40   : > { %2471 = vmatpush1.bf16.msra.mxu0 %v3538_v6  ;;  %2180 = vmatprep.subr.bf16.mxu1 %v3539_v7  ;;  %v3581_v6 = vld [vmem:[%s4851_s1 + $0x160] ss:$8 sps:$4 sm:$0xff]  }
  0x41   : > { %2472 = vmatprep.subr.bf16.mxu0 %v3541_v8  ;;  %v3584_v7 = vld [vmem:[%s4851_s1 + $0x560] ss:$8 sps:$4 sm:$0xff]   ;;  %v3059_v8 = vcombine.high %v340_v2, %v348_v3 }
  0x43   : > { %2181 = vmatpush1.bf16.msra.mxu1 %v3543_v9  ;;  %v344_v9 = vmax.bf16 %v3822_v50, %v280_v4 }
  0x44   : > { %2473 = vmatpush1.bf16.msra.mxu0 %v3544_v10  ;;  %2223 = vmatprep.subr.bf16.mxu1 %v3547_v11  ;;  %v352_v10 = vmax.bf16 %v3822_v50, %v288_v5  ;;  %v3589_v11 = vld [vmem:[%s4851_s1 + $0x174] ss:$8 sps:$4 sm:$0xff]   ;;  %v313_v5 = vmax.bf16 %v3822_v50, %v249_v62  ;;  %v3679_v62 = vld [vmem:[%s4851_s1 + $0x264] ss:$8 sps:$4 sm:$0xff]  }
  0x45   : > { %2515 = vmatprep.subr.bf16.mxu0 %v3550_v12  ;;  %v3592_v12 = vld [vmem:[%s4851_s1 + $0x574] ss:$8 sps:$4 sm:$0xff]  }
  0x46   : > { %2183 = vmatmul.mubr.bf16.vlgmr.msra.gmra.mrb[0].mxu1 %v3010_v15  ;;  %v3590_v15 = vld [vmem:[%s4851_s1 + $0x570] ss:$8 sps:$4 sm:$0xff]  }
  0x47   : > { %2475 = vmatmul.mubr.bf16.vlgmr.msra.gmra.mrb[0].mxu0 %v3018_v16  ;;  %2224 = vmatpush1.bf16.msra.mxu1 %v3545_v13  ;;  %v3067_v13 = vcombine.high %v344_v9, %v352_v10  ;;  %v229_v16 = vld [vmem:[%s3998_s12 + $0x8] sm:$0xff] }
  0x48   : > { %2516 = vmatpush1.bf16.msra.mxu0 %v3548_v14  ;;  %2225 = vmatprep.subr.bf16.mxu1 %v3553_v17  ;;  %v3587_v14 = vld [vmem:[%s4851_s1 + $0x170] ss:$8 sps:$4 sm:$0xff]   ;;  %v3058_v17 = vcombine.low %v340_v2, %v348_v3  ;;  %v3646_v2 = vld [vmem:[%s4851_s1 + $0x604] ss:$8 sps:$4 sm:$0xff]  }
  0x49   : > { %2517 = vmatprep.subr.bf16.mxu0 %v3556_v18  ;;  %2192 = vmatprep.mubr.bf16.mxu1 %v3027_v34  ;;  %v3066_v18 = vcombine.low %v344_v9, %v352_v10  ;;  %v3599_v34 = vld [vmem:[%s4851_s1 + $0x190] ss:$8 sps:$4 sm:$0xff]   ;;  %v3644_v10 = vld [vmem:[%s4851_s1 + $0x600] ss:$8 sps:$4 sm:$0xff]  }
  0x4a   : > { %2484 = vmatprep.mubr.bf16.mxu0 %v3035_v40  ;;  %v3613_v40 = vld [vmem:[%s4851_s1 + $0x1b4] ss:$8 sps:$4 sm:$0xff]  }
  0x4b   : > { %2226 = vmatpush1.bf16.msra.mxu1 %v3551_v19  ;;  %v237_v19 = vld [vmem:[%s3998_s12 + $0x48] sm:$0xff] }
  0x4c   : > { %2518 = vmatpush1.bf16.msra.mxu0 %v3554_v20  ;;  %2227 = vmatprep.subr.bf16.mxu1 %v3559_v21  ;;  %v4191_v20 = vmax.bf16 %v3822_v50, %v229_v16  ;;  %v3595_v21 = vld [vmem:[%s4851_s1 + $0x184] ss:$8 sps:$4 sm:$0xff]  }
  0x4d   : > { %2519 = vmatprep.subr.bf16.mxu0 %v3562_v22  ;;  %v3598_v22 = vld [vmem:[%s4851_s1 + $0x584] ss:$8 sps:$4 sm:$0xff]  }
  0x4e   : > { %2193 = vmatmul.mubr.bf16.gmra.mrb[4].mxu1 %v3026_v38  ;;  %v3605_v38 = vld [vmem:[%s4851_s1 + $0x1a0] ss:$8 sps:$4 sm:$0xff]  }
  0x4f   : > { %2228 = vmatpush1.bf16.msra.mxu1 %v3557_v23  ;;  %2485 = vmatmul.mubr.bf16.gmra.mrb[4].mxu0 %v3034_v41  ;;  %v4200_v23 = vmax.bf16 %v3822_v50, %v237_v19  ;;  %v3616_v41 = vld [vmem:[%s4851_s1 + $0x5b4] ss:$8 sps:$4 sm:$0xff]   ;;  %v269_v16 = vld [vmem:[%s3998_s12 + $0x148] sm:$0xff]  ;;  %v3647_v19 = vld [vmem:[%s4851_s1 + $0x210] ss:$8 sps:$4 sm:$0xff]  }
  0x50   : > { %2520 = vmatpush1.bf16.msra.mxu0 %v3560_v24  ;;  %2229 = vmatprep.subr.bf16.mxu1 %v3565_v28  ;;  %v233_v24 = vld [vmem:[%s3998_s12 + $0x28] sm:$0xff]  ;;  %v4210_v28 = vmax.bf16 %v3822_v50, %v241_v25 }
  0x51   : > { %2521 = vmatprep.subr.bf16.mxu0 %v3568_v29  ;;  %2202 = vmatprep.mubr.bf16.mxu1 %v3043_v53  ;;  %v4205_v26 = vmax.bf16 %v3822_v50, %v233_v24  ;;  %v3013_v27 = vcombine.high %v4191_v20, %v4200_v23  ;;  %v3593_v29 = vld [vmem:[%s4851_s1 + $0x180] ss:$8 sps:$4 sm:$0xff]   ;;  %v3631_v53 = vld [vmem:[%s4851_s1 + $0x1e4] ss:$8 sps:$4 sm:$0xff]   ;;  %v333_v24 = vmax.bf16 %v3822_v50, %v269_v16 }
  0x52   : > { %2494 = vmatprep.mubr.bf16.mxu0 %v3051_v57  ;;  %v3637_v57 = vld [vmem:[%s4851_s1 + $0x1f4] ss:$8 sps:$4 sm:$0xff]   ;;  %v3689_v16 = vld [vmem:[%s4851_s1 + $0x280] ss:$8 sps:$4 sm:$0xff]  }
  0x53   : > { %2230 = vmatpush1.bf16.msra.mxu1 %v3563_v36  ;;  %v3021_v32 = vcombine.high %v4205_v26, %v4210_v28  ;;  %v3607_v36 = vld [vmem:[%s4851_s1 + $0x1a4] ss:$8 sps:$4 sm:$0xff]   ;;  %v3020_v9 = vcombine.low %v4205_v26, %v4210_v28  ;;  %v3656_v28 = vld [vmem:[%s4851_s1 + $0x620] ss:$8 sps:$4 sm:$0xff]  }
  0x54   : > { %2522 = vmatpush1.bf16.msra.mxu0 %v3566_v37  ;;  %2231 = vmatprep.subr.bf16.mxu1 %v3571_v39  ;;  %v3610_v37 = vld [vmem:[%s4851_s1 + $0x5a4] ss:$8 sps:$4 sm:$0xff]   ;;  %v3608_v39 = vld [vmem:[%s4851_s1 + $0x5a0] ss:$8 sps:$4 sm:$0xff]  }
  0x55   : > { %2523 = vmatprep.subr.bf16.mxu0 %v3574_v42  ;;  %v3611_v42 = vld [vmem:[%s4851_s1 + $0x1b0] ss:$8 sps:$4 sm:$0xff]  }
  0x56   : > { %2203 = vmatmul.mubr.bf16.gmra.mrb[8].mxu1 %v3042_v60  ;;  %v245_v60 = vld [vmem:[%s3998_s12 + $0x88] sm:$0xff] }
  0x57   : > { %2232 = vmatpush1.bf16.msra.mxu1 %v3569_v45  ;;  %2495 = vmatmul.mubr.bf16.gmra.mrb[8].mxu0 %v3050_v61  ;;  %v3622_v45 = vld [vmem:[%s4851_s1 + $0x5c4] ss:$8 sps:$4 sm:$0xff]   ;;  %v309_v3 = vmax.bf16 %v3822_v50, %v245_v60  ;;  %v234_v60 = vld [vmem:[%s3998_s12 + $0x30] sm:$0xff] }
  0x58   : > { %2524 = vmatpush1.bf16.msra.mxu0 %v3572_v48  ;;  %2233 = vmatprep.subr.bf16.mxu1 %v3577_v52  ;;  %v3625_v48 = vld [vmem:[%s4851_s1 + $0x1d4] ss:$8 sps:$4 sm:$0xff]   ;;  %v3626_v52 = vld [vmem:[%s4851_s1 + $0x5d0] ss:$8 sps:$4 sm:$0xff]   ;;  %v253_v61 = vld [vmem:[%s3998_s12 + $0xc8] sm:$0xff] }
  0x59   : > { %2525 = vmatprep.subr.bf16.mxu0 %v3580_v56  ;;  %2212 = vmatprep.mubr.bf16.mxu1 %v3059_v8  ;;  %v3632_v56 = vld [vmem:[%s4851_s1 + $0x5e0] ss:$8 sps:$4 sm:$0xff]   ;;  %v317_v4 = vmax.bf16 %v3822_v50, %v253_v61  ;;  %v242_v61 = vld [vmem:[%s3998_s12 + $0x70] sm:$0xff] }
  0x5a   : > { %2504 = vmatprep.mubr.bf16.mxu0 %v3067_v13  ;;  %v3641_v8 = vld [vmem:[%s4851_s1 + $0x200] ss:$8 sps:$4 sm:$0xff]  }
  0x5b   : > { %2234 = vmatpush1.bf16.msra.mxu1 %v3575_v58  ;;  %v3640_v58 = vld [vmem:[%s4851_s1 + $0x5f4] ss:$8 sps:$4 sm:$0xff]   ;;  %v3029_v13 = vcombine.high %v309_v3, %v317_v4 }
  0x5c   : > { %2526 = vmatpush1.bf16.msra.mxu0 %v3578_v59  ;;  %2235 = vmatprep.subr.bf16.mxu1 %v3583_v0  ;;  %v3635_v59 = vld [vmem:[%s4851_s1 + $0x1f0] ss:$8 sps:$4 sm:$0xff]  }
  0x5d   : > { %2527 = vmatprep.subr.bf16.mxu0 %v3586_v1  ;;  %v3638_v0 = vld [vmem:[%s4851_s1 + $0x5f0] ss:$8 sps:$4 sm:$0xff]   ;;  %v3643_v1 = vld [vmem:[%s4851_s1 + $0x204] ss:$8 sps:$4 sm:$0xff]  }
  0x5e   : > { %2213 = vmatmul.mubr.bf16.gmra.mrb[12].mxu1 %v3058_v17  ;;  %v265_v17 = vld [vmem:[%s3998_s12 + $0x128] sm:$0xff] }
  0x5f   : > { %2236 = vmatpush1.bf16.msra.mxu1 %v3581_v6  ;;  %2505 = vmatmul.mubr.bf16.gmra.mrb[12].mxu0 %v3066_v18  ;;  %v321_v6 = vmax.bf16 %v3822_v50, %v257_v63  ;;  %v273_v18 = vld [vmem:[%s3998_s12 + $0x168] sm:$0xff]  ;;  %v329_v25 = vmax.bf16 %v3822_v50, %v265_v17 }
  0x60   : > { %2528 = vmatpush1.bf16.msra.mxu0 %v3584_v7  ;;  %2237 = vmatprep.subr.bf16.mxu1 %v3589_v11  ;;  %v3012_v7 = vcombine.low %v4191_v20, %v4200_v23  ;;  %v3649_v11 = vld [vmem:[%s4851_s1 + $0x214] ss:$8 sps:$4 sm:$0xff]   ;;  %v3650_v20 = vld [vmem:[%s4851_s1 + $0x610] ss:$8 sps:$4 sm:$0xff]   ;;  %v337_v26 = vmax.bf16 %v3822_v50, %v273_v18  ;;  %v3682_v63 = vld [vmem:[%s4851_s1 + $0x664] ss:$8 sps:$4 sm:$0xff]  }
  0x61   : > { %2529 = vmatprep.subr.bf16.mxu0 %v3592_v12  ;;  %2255 = vmatprep.mubr.bf16.mxu1 %v3013_v27  ;;  %v3652_v12 = vld [vmem:[%s4851_s1 + $0x614] ss:$8 sps:$4 sm:$0xff]   ;;  %v3653_v27 = vld [vmem:[%s4851_s1 + $0x220] ss:$8 sps:$4 sm:$0xff]  }
  0x62   : > { %2547 = vmatprep.mubr.bf16.mxu0 %v3021_v32  ;;  %v3664_v32 = vld [vmem:[%s4851_s1 + $0x634] ss:$8 sps:$4 sm:$0xff]   ;;  %v3692_v17 = vld [vmem:[%s4851_s1 + $0x680] ss:$8 sps:$4 sm:$0xff]  }
  0x63   : > { %2238 = vmatpush1.bf16.msra.mxu1 %v3587_v14  ;;  %v3037_v14 = vcombine.high %v313_v5, %v321_v6  ;;  %v3697_v18 = vld [vmem:[%s4851_s1 + $0x294] ss:$8 sps:$4 sm:$0xff]  }
  0x64   : > { %2530 = vmatpush1.bf16.msra.mxu0 %v3590_v15  ;;  %2239 = vmatprep.subr.bf16.mxu1 %v3595_v21  ;;  %v261_v15 = vld [vmem:[%s3998_s12 + $0x108] sm:$0xff] }
  0x65   : > { %2531 = vmatprep.subr.bf16.mxu0 %v3598_v22  ;;  %v3655_v21 = vld [vmem:[%s4851_s1 + $0x224] ss:$8 sps:$4 sm:$0xff]   ;;  %v325_v23 = vmax.bf16 %v3822_v50, %v261_v15 }
  0x66   : > { %v3658_v22 = vld [vmem:[%s4851_s1 + $0x624] ss:$8 sps:$4 sm:$0xff]  }
  0x67   : > { %2240 = vmatpush1.bf16.msra.mxu1 %v3593_v29  ;;  %v3028_v29 = vcombine.low %v309_v3, %v317_v4  ;;  %v4424_v3 = vmax.bf16 %v3822_v50, %v242_v61  ;;  %v3694_v15 = vld [vmem:[%s4851_s1 + $0x684] ss:$8 sps:$4 sm:$0xff]   ;;  %v3745_v61 = vld [vmem:[%s4851_s1 + $0x314] ss:$8 sps:$4 sm:$0xff]  }
  0x68   : > { %2532 = vmatpush1.bf16.msra.mxu0 %v3596_v30  ;;  %2241 = vmatprep.subr.bf16.mxu1 %v3601_v31  ;;  %v3036_v30 = vcombine.low %v313_v5, %v321_v6  ;;  %v3661_v31 = vld [vmem:[%s4851_s1 + $0x234] ss:$8 sps:$4 sm:$0xff]   ;;  %v3677_v6 = vld [vmem:[%s4851_s1 + $0x260] ss:$8 sps:$4 sm:$0xff]  }
  0x69   : > { %2533 = vmatprep.subr.bf16.mxu0 %v3604_v33  ;;  %v3045_v33 = vcombine.high %v325_v23, %v333_v24 }
  0x6b   : > { %2242 = vmatpush1.bf16.msra.mxu1 %v3599_v34  ;;  %v3053_v34 = vcombine.high %v329_v25, %v337_v26 }
  0x6c   : > { %2534 = vmatpush1.bf16.msra.mxu0 %v3602_v35  ;;  %2243 = vmatprep.subr.bf16.mxu1 %v3607_v36  ;;  %v277_v35 = vld [vmem:[%s3998_s12 + $0x188] sm:$0xff] }
  0x6d   : > { %2535 = vmatprep.subr.bf16.mxu0 %v3610_v37  ;;  %v285_v36 = vld [vmem:[%s3998_s12 + $0x1c8] sm:$0xff] }
  0x6e   : > { %v281_v37 = vld [vmem:[%s3998_s12 + $0x1a8] sm:$0xff] }
  0x6f   : > { %2244 = vmatpush1.bf16.msra.mxu1 %v3605_v38  ;;  %v289_v38 = vld [vmem:[%s3998_s12 + $0x1e8] sm:$0xff] }
  0x70   : > { %2536 = vmatpush1.bf16.msra.mxu0 %v3608_v39  ;;  %2245 = vmatprep.subr.bf16.mxu1 %v3613_v40  ;;  %v3659_v39 = vld [vmem:[%s4851_s1 + $0x230] ss:$8 sps:$4 sm:$0xff]  }
  0x71   : > { %2537 = vmatprep.subr.bf16.mxu0 %v3616_v41  ;;  %v3662_v40 = vld [vmem:[%s4851_s1 + $0x630] ss:$8 sps:$4 sm:$0xff]   ;;  %v3667_v41 = vld [vmem:[%s4851_s1 + $0x244] ss:$8 sps:$4 sm:$0xff]  }
  0x73   : > { %2246 = vmatpush1.bf16.msra.mxu1 %v3611_v42  ;;  %v3670_v42 = vld [vmem:[%s4851_s1 + $0x644] ss:$8 sps:$4 sm:$0xff]  }
  0x74   : > { %2538 = vmatpush1.bf16.msra.mxu0 %v3614_v43  ;;  %2247 = vmatprep.subr.bf16.mxu1 %v3619_v44  ;;  %v341_v43 = vmax.bf16 %v3822_v50, %v277_v35  ;;  %v349_v44 = vmax.bf16 %v3822_v50, %v285_v36  ;;  %v3724_v35 = vld [vmem:[%s4851_s1 + $0x6d4] ss:$8 sps:$4 sm:$0xff]   ;;  %v3719_v36 = vld [vmem:[%s4851_s1 + $0x2d0] ss:$8 sps:$4 sm:$0xff]  }
  0x75   : > { %2539 = vmatprep.subr.bf16.mxu0 %v3622_v45  ;;  %v345_v45 = vmax.bf16 %v3822_v50, %v281_v37  ;;  %v3722_v37 = vld [vmem:[%s4851_s1 + $0x6d0] ss:$8 sps:$4 sm:$0xff]  }
  0x76   : > { %v3060_v4 = vcombine.low %v341_v43, %v349_v44 }
  0x77   : > { %2248 = vmatpush1.bf16.msra.mxu1 %v3617_v46  ;;  %v353_v46 = vmax.bf16 %v3822_v50, %v289_v38  ;;  %v3727_v38 = vld [vmem:[%s4851_s1 + $0x2e4] ss:$8 sps:$4 sm:$0xff]  }
  0x78   : > { %2540 = vmatpush1.bf16.msra.mxu0 %v3620_v47  ;;  %2249 = vmatprep.subr.bf16.mxu1 %v3625_v48  ;;  %v3665_v47 = vld [vmem:[%s4851_s1 + $0x240] ss:$8 sps:$4 sm:$0xff]  }
  0x79   : > { %2541 = vmatprep.subr.bf16.mxu0 %v3628_v49  ;;  %v3668_v48 = vld [vmem:[%s4851_s1 + $0x640] ss:$8 sps:$4 sm:$0xff]   ;;  %v3044_v49 = vcombine.low %v325_v23, %v333_v24  ;;  %v3068_v5 = vcombine.low %v345_v45, %v353_v46  ;;  %v3706_v23 = vld [vmem:[%s4851_s1 + $0x6a4] ss:$8 sps:$4 sm:$0xff]  }
  0x7a   : > { %v3701_v24 = vld [vmem:[%s4851_s1 + $0x2a0] ss:$8 sps:$4 sm:$0xff]  }
  0x7b   : > { %2250 = vmatpush1.bf16.msra.mxu1 %v3623_v51  ;;  %v3052_v51 = vcombine.low %v329_v25, %v337_v26  ;;  %v3704_v25 = vld [vmem:[%s4851_s1 + $0x6a0] ss:$8 sps:$4 sm:$0xff]   ;;  %v3709_v26 = vld [vmem:[%s4851_s1 + $0x2b4] ss:$8 sps:$4 sm:$0xff]  }
  0x7c   : > { %2542 = vmatpush1.bf16.msra.mxu0 %v3626_v52  ;;  %2251 = vmatprep.subr.bf16.mxu1 %v3631_v53  ;;  %v3673_v52 = vld [vmem:[%s4851_s1 + $0x254] ss:$8 sps:$4 sm:$0xff]  }
  0x7d   : > { %2543 = vmatprep.subr.bf16.mxu0 %v3634_v54  ;;  %v3676_v53 = vld [vmem:[%s4851_s1 + $0x654] ss:$8 sps:$4 sm:$0xff]   ;;  %v3671_v54 = vld [vmem:[%s4851_s1 + $0x250] ss:$8 sps:$4 sm:$0xff]  }
  0x7f   : > { %2252 = vmatpush1.bf16.msra.mxu1 %v3629_v55  ;;  %v3674_v55 = vld [vmem:[%s4851_s1 + $0x650] ss:$8 sps:$4 sm:$0xff]  }
  0x80   : > { %2544 = vmatpush1.bf16.msra.mxu0 %v3632_v56  ;;  %2253 = vmatprep.subr.bf16.mxu1 %v3637_v57  ;;  %v3061_v56 = vcombine.high %v341_v43, %v349_v44  ;;  %v3069_v57 = vcombine.high %v345_v45, %v353_v46  ;;  %v3736_v43 = vld [vmem:[%s4851_s1 + $0x6f4] ss:$8 sps:$4 sm:$0xff]  }
  0x81   : > { %2545 = vmatprep.subr.bf16.mxu0 %v3640_v58  ;;  %v230_v58 = vld [vmem:[%s3998_s12 + $0x10] sm:$0xff] }
  0x82   : > { %v250_v44 = vld [vmem:[%s3998_s12 + $0xb0] sm:$0xff] }
  0x83   : > { %2254 = vmatpush1.bf16.msra.mxu1 %v3635_v59  ;;  %v238_v59 = vld [vmem:[%s3998_s12 + $0x50] sm:$0xff] }
  0x84   : > { %2546 = vmatpush1.bf16.msra.mxu0 %v3638_v0  ;;  %2296 = vmatprep.subr.bf16.mxu1 %v3643_v1  ;;  %v4415_v0 = vmax.bf16 %v3822_v50, %v230_v58  ;;  %v4418_v1 = vmax.bf16 %v3822_v50, %v238_v59  ;;  %v258_v45 = vld [vmem:[%s3998_s12 + $0xf0] sm:$0xff]  ;;  %v3737_v59 = vld [vmem:[%s4851_s1 + $0x300] ss:$8 sps:$4 sm:$0xff]  }
  0x85   : > { %2588 = vmatprep.subr.bf16.mxu0 %v3646_v2  ;;  %v4421_v2 = vmax.bf16 %v3822_v50, %v234_v60  ;;  %v246_v46 = vld [vmem:[%s3998_s12 + $0x90] sm:$0xff]  ;;  %v3740_v60 = vld [vmem:[%s4851_s1 + $0x700] ss:$8 sps:$4 sm:$0xff]  }
  0x86   : > { %2256 = vmatmul.mubr.bf16.vlgmr.msra.gmra.mrb[0].mxu1 %v3012_v7  ;;  %v3680_v7 = vld [vmem:[%s4851_s1 + $0x660] ss:$8 sps:$4 sm:$0xff]  }
  0x87   : > { %2548 = vmatmul.mubr.bf16.vlgmr.msra.gmra.mrb[0].mxu0 %v3020_v9  ;;  %2297 = vmatpush1.bf16.msra.mxu1 %v3641_v8  ;;  %v3685_v8 = vld [vmem:[%s4851_s1 + $0x274] ss:$8 sps:$4 sm:$0xff]   ;;  %v3022_v58 = vcombine.low %v4421_v2, %v4424_v3 }
  0x88   : > { %2589 = vmatpush1.bf16.msra.mxu0 %v3644_v10  ;;  %2298 = vmatprep.subr.bf16.mxu1 %v3649_v11  ;;  %v3688_v9 = vld [vmem:[%s4851_s1 + $0x674] ss:$8 sps:$4 sm:$0xff]   ;;  %v3015_v10 = vcombine.high %v4415_v0, %v4418_v1  ;;  %v3023_v11 = vcombine.high %v4421_v2, %v4424_v3 }
  0x89   : > { %2590 = vmatprep.subr.bf16.mxu0 %v3652_v12  ;;  %2265 = vmatprep.mubr.bf16.mxu1 %v3029_v13  ;;  %v3683_v12 = vld [vmem:[%s4851_s1 + $0x270] ss:$8 sps:$4 sm:$0xff]  }
  0x8a   : > { %2557 = vmatprep.mubr.bf16.mxu0 %v3037_v14  ;;  %v3686_v13 = vld [vmem:[%s4851_s1 + $0x670] ss:$8 sps:$4 sm:$0xff]   ;;  %v3691_v14 = vld [vmem:[%s4851_s1 + $0x284] ss:$8 sps:$4 sm:$0xff]  }
  0x8b   : > { %2299 = vmatpush1.bf16.msra.mxu1 %v3647_v19  ;;  %v3700_v19 = vld [vmem:[%s4851_s1 + $0x694] ss:$8 sps:$4 sm:$0xff]  }
  0x8c   : > { %2591 = vmatpush1.bf16.msra.mxu0 %v3650_v20  ;;  %2300 = vmatprep.subr.bf16.mxu1 %v3655_v21  ;;  %v3695_v20 = vld [vmem:[%s4851_s1 + $0x290] ss:$8 sps:$4 sm:$0xff]  }
  0x8d   : > { %2592 = vmatprep.subr.bf16.mxu0 %v3658_v22  ;;  %v3698_v21 = vld [vmem:[%s4851_s1 + $0x690] ss:$8 sps:$4 sm:$0xff]   ;;  %v3703_v22 = vld [vmem:[%s4851_s1 + $0x2a4] ss:$8 sps:$4 sm:$0xff]  }
  0x8e   : > { %2266 = vmatmul.mubr.bf16.gmra.mrb[4].mxu1 %v3028_v29  ;;  %v3710_v29 = vld [vmem:[%s4851_s1 + $0x6b0] ss:$8 sps:$4 sm:$0xff]  }
  0x8f   : > { %2558 = vmatmul.mubr.bf16.gmra.mrb[4].mxu0 %v3036_v30  ;;  %2301 = vmatpush1.bf16.msra.mxu1 %v3653_v27  ;;  %v3712_v27 = vld [vmem:[%s4851_s1 + $0x6b4] ss:$8 sps:$4 sm:$0xff]   ;;  %v3715_v30 = vld [vmem:[%s4851_s1 + $0x2c4] ss:$8 sps:$4 sm:$0xff]  }
  0x90   : > { %2593 = vmatpush1.bf16.msra.mxu0 %v3656_v28  ;;  %2302 = vmatprep.subr.bf16.mxu1 %v3661_v31  ;;  %v3707_v28 = vld [vmem:[%s4851_s1 + $0x2b0] ss:$8 sps:$4 sm:$0xff]   ;;  %v3718_v31 = vld [vmem:[%s4851_s1 + $0x6c4] ss:$8 sps:$4 sm:$0xff]  }
  0x91   : > { %2594 = vmatprep.subr.bf16.mxu0 %v3664_v32  ;;  %2275 = vmatprep.mubr.bf16.mxu1 %v3045_v33  ;;  %v3713_v32 = vld [vmem:[%s4851_s1 + $0x2c0] ss:$8 sps:$4 sm:$0xff]   ;;  %v274_v2 = vld [vmem:[%s3998_s12 + $0x170] sm:$0xff] }
  0x92   : > { %2567 = vmatprep.mubr.bf16.mxu0 %v3053_v34  ;;  %v3716_v33 = vld [vmem:[%s4851_s1 + $0x6c0] ss:$8 sps:$4 sm:$0xff]   ;;  %v3721_v34 = vld [vmem:[%s4851_s1 + $0x2d4] ss:$8 sps:$4 sm:$0xff]  }
  0x93   : > { %2303 = vmatpush1.bf16.msra.mxu1 %v3659_v39  ;;  %v3730_v39 = vld [vmem:[%s4851_s1 + $0x6e4] ss:$8 sps:$4 sm:$0xff]   ;;  %v262_v3 = vld [vmem:[%s3998_s12 + $0x110] sm:$0xff] }
  0x94   : > { %2595 = vmatpush1.bf16.msra.mxu0 %v3662_v40  ;;  %2304 = vmatprep.subr.bf16.mxu1 %v3667_v41  ;;  %v3725_v40 = vld [vmem:[%s4851_s1 + $0x2e0] ss:$8 sps:$4 sm:$0xff]  }
  0x95   : > { %2596 = vmatprep.subr.bf16.mxu0 %v3670_v42  ;;  %v3728_v41 = vld [vmem:[%s4851_s1 + $0x6e0] ss:$8 sps:$4 sm:$0xff]   ;;  %v3733_v42 = vld [vmem:[%s4851_s1 + $0x2f4] ss:$8 sps:$4 sm:$0xff]  }
  0x96   : > { %2276 = vmatmul.mubr.bf16.gmra.mrb[8].mxu1 %v3044_v49  ;;  %v3734_v49 = vld [vmem:[%s4851_s1 + $0x6f0] ss:$8 sps:$4 sm:$0xff]  }
  0x97   : > { %2568 = vmatmul.mubr.bf16.gmra.mrb[8].mxu0 %v3052_v51  ;;  %2305 = vmatpush1.bf16.msra.mxu1 %v3665_v47  ;;  %v254_v47 = vld [vmem:[%s3998_s12 + $0xd0] sm:$0xff]  ;;  %v3739_v51 = vld [vmem:[%s4851_s1 + $0x304] ss:$8 sps:$4 sm:$0xff]  }
  0x98   : > { %2597 = vmatpush1.bf16.msra.mxu0 %v3668_v48  ;;  %2306 = vmatprep.subr.bf16.mxu1 %v3673_v52  ;;  %v3731_v48 = vld [vmem:[%s4851_s1 + $0x2f0] ss:$8 sps:$4 sm:$0xff]   ;;  %v3742_v52 = vld [vmem:[%s4851_s1 + $0x704] ss:$8 sps:$4 sm:$0xff]  }
  0x99   : > { %2598 = vmatprep.subr.bf16.mxu0 %v3676_v53  ;;  %2285 = vmatprep.mubr.bf16.mxu1 %v3061_v56  ;;  %v314_v53 = vmax.bf16 %v3822_v50, %v250_v44  ;;  %v318_v56 = vmax.bf16 %v3822_v50, %v254_v47  ;;  %v239_v44 = vld [vmem:[%s3998_s12 + $0x58] sm:$0xff]  ;;  %v3775_v47 = vld [vmem:[%s4851_s1 + $0x364] ss:$8 sps:$4 sm:$0xff]  }
  0x9a   : > { %2577 = vmatprep.mubr.bf16.mxu0 %v3069_v57  ;;  %v3014_v57 = vcombine.low %v4415_v0, %v4418_v1  ;;  %v266_v0 = vld [vmem:[%s3998_s12 + $0x130] sm:$0xff] }
  0x9b   : > { %2307 = vmatpush1.bf16.msra.mxu1 %v3671_v54  ;;  %v322_v54 = vmax.bf16 %v3822_v50, %v258_v45  ;;  %v3767_v45 = vld [vmem:[%s4851_s1 + $0x350] ss:$8 sps:$4 sm:$0xff]  }
  0x9c   : > { %2599 = vmatpush1.bf16.msra.mxu0 %v3674_v55  ;;  %2308 = vmatprep.subr.bf16.mxu1 %v3679_v62  ;;  %v310_v55 = vmax.bf16 %v3822_v50, %v246_v46  ;;  %v3748_v62 = vld [vmem:[%s4851_s1 + $0x714] ss:$8 sps:$4 sm:$0xff]   ;;  %v3770_v46 = vld [vmem:[%s4851_s1 + $0x750] ss:$8 sps:$4 sm:$0xff]  }
  0x9d   : > { %2600 = vmatprep.subr.bf16.mxu0 %v3682_v63  ;;  %v3039_v63 = vcombine.high %v314_v53, %v322_v54 }
  0x9e   : > { %2286 = vmatmul.mubr.bf16.gmra.mrb[12].mxu1 %v3060_v4  ;;  %v3031_v1 = vcombine.high %v310_v55, %v318_v56  ;;  %v270_v4 = vld [vmem:[%s3998_s12 + $0x150] sm:$0xff] }
  0x9f   : > { %2578 = vmatmul.mubr.bf16.gmra.mrb[12].mxu0 %v3068_v5  ;;  %2309 = vmatpush1.bf16.msra.mxu1 %v3677_v6  ;;  %v3743_v5 = vld [vmem:[%s4851_s1 + $0x310] ss:$8 sps:$4 sm:$0xff]  }
  0xa0   : > { %2601 = vmatpush1.bf16.msra.mxu0 %v3680_v7  ;;  %2310 = vmatprep.subr.bf16.mxu1 %v3685_v8  ;;  %v3746_v6 = vld [vmem:[%s4851_s1 + $0x710] ss:$8 sps:$4 sm:$0xff]   ;;  %v3751_v7 = vld [vmem:[%s4851_s1 + $0x324] ss:$8 sps:$4 sm:$0xff]  }
  0xa1   : > { %2602 = vmatprep.subr.bf16.mxu0 %v3688_v9  ;;  %2328 = vmatprep.mubr.bf16.mxu1 %v3015_v10  ;;  %v3754_v8 = vld [vmem:[%s4851_s1 + $0x724] ss:$8 sps:$4 sm:$0xff]   ;;  %v330_v9 = vmax.bf16 %v3822_v50, %v266_v0  ;;  %v338_v10 = vmax.bf16 %v3822_v50, %v274_v2  ;;  %v598_v2 = vld [vmem:[%s4851_s1 + $0x790] sm:$0xff] }
  0xa2   : > { %2620 = vmatprep.mubr.bf16.mxu0 %v3023_v11  ;;  %v326_v11 = vmax.bf16 %v3822_v50, %v262_v3  ;;  %v3787_v0 = vld [vmem:[%s4851_s1 + $0x384] ss:$8 sps:$4 sm:$0xff]   ;;  %v3785_v3 = vld [vmem:[%s4851_s1 + $0x380] ss:$8 sps:$4 sm:$0xff]  }
  0xa3   : > { %2311 = vmatpush1.bf16.msra.mxu1 %v3683_v12  ;;  %v334_v12 = vmax.bf16 %v3822_v50, %v270_v4  ;;  %v3788_v4 = vld [vmem:[%s4851_s1 + $0x780] ss:$8 sps:$4 sm:$0xff]  }
  0xa4   : > { %2603 = vmatpush1.bf16.msra.mxu0 %v3686_v13  ;;  %2312 = vmatprep.subr.bf16.mxu1 %v3691_v14  ;;  %v3038_v13 = vcombine.low %v314_v53, %v322_v54  ;;  %v3030_v14 = vcombine.low %v310_v55, %v318_v56  ;;  %v4660_v53 = vmax.bf16 %v3822_v50, %v239_v44  ;;  %v3773_v56 = vld [vmem:[%s4851_s1 + $0x360] ss:$8 sps:$4 sm:$0xff]  }
  0xa5   : > { %2604 = vmatprep.subr.bf16.mxu0 %v3694_v15  ;;  %v3749_v15 = vld [vmem:[%s4851_s1 + $0x320] ss:$8 sps:$4 sm:$0xff]  }
  0xa7   : > { %2313 = vmatpush1.bf16.msra.mxu1 %v3689_v16  ;;  %v3752_v16 = vld [vmem:[%s4851_s1 + $0x720] ss:$8 sps:$4 sm:$0xff]  }
  0xa8   : > { %2605 = vmatpush1.bf16.msra.mxu0 %v3692_v17  ;;  %2314 = vmatprep.subr.bf16.mxu1 %v3697_v18  ;;  %v3757_v17 = vld [vmem:[%s4851_s1 + $0x334] ss:$8 sps:$4 sm:$0xff]  }
  0xa9   : > { %2606 = vmatprep.subr.bf16.mxu0 %v3700_v19  ;;  %v3760_v18 = vld [vmem:[%s4851_s1 + $0x734] ss:$8 sps:$4 sm:$0xff]   ;;  %v3055_v19 = vcombine.high %v330_v9, %v338_v10 }
  0xab   : > { %2315 = vmatpush1.bf16.msra.mxu1 %v3695_v20  ;;  %v282_v20 = vld [vmem:[%s3998_s12 + $0x1b0] sm:$0xff] }
  0xac   : > { %2607 = vmatpush1.bf16.msra.mxu0 %v3698_v21  ;;  %2316 = vmatprep.subr.bf16.mxu1 %v3703_v22  ;;  %v3047_v21 = vcombine.high %v326_v11, %v334_v12  ;;  %v290_v22 = vld [vmem:[%s3998_s12 + $0x1f0] sm:$0xff] }
  0xad   : > { %2608 = vmatprep.subr.bf16.mxu0 %v3706_v23  ;;  %v278_v23 = vld [vmem:[%s3998_s12 + $0x190] sm:$0xff] }
  0xaf   : > { %2317 = vmatpush1.bf16.msra.mxu1 %v3701_v24  ;;  %v286_v24 = vld [vmem:[%s3998_s12 + $0x1d0] sm:$0xff] }
  0xb0   : > { %2609 = vmatpush1.bf16.msra.mxu0 %v3704_v25  ;;  %2318 = vmatprep.subr.bf16.mxu1 %v3709_v26  ;;  %v3755_v25 = vld [vmem:[%s4851_s1 + $0x330] ss:$8 sps:$4 sm:$0xff]  }
  0xb1   : > { %2610 = vmatprep.subr.bf16.mxu0 %v3712_v27  ;;  %v3758_v26 = vld [vmem:[%s4851_s1 + $0x730] ss:$8 sps:$4 sm:$0xff]   ;;  %v3763_v27 = vld [vmem:[%s4851_s1 + $0x344] ss:$8 sps:$4 sm:$0xff]  }
  0xb3   : > { %2319 = vmatpush1.bf16.msra.mxu1 %v3707_v28  ;;  %v3766_v28 = vld [vmem:[%s4851_s1 + $0x744] ss:$8 sps:$4 sm:$0xff]  }
  0xb4   : > { %2611 = vmatpush1.bf16.msra.mxu0 %v3710_v29  ;;  %2320 = vmatprep.subr.bf16.mxu1 %v3715_v30  ;;  %v346_v29 = vmax.bf16 %v3822_v50, %v282_v20  ;;  %v354_v30 = vmax.bf16 %v3822_v50, %v290_v22  ;;  %v275_v20 = vld [vmem:[%s3998_s12 + $0x178] sm:$0xff] }
  0xb5   : > { %2612 = vmatprep.subr.bf16.mxu0 %v3718_v31  ;;  %v342_v31 = vmax.bf16 %v3822_v50, %v278_v23  ;;  %v339_v23 = vmax.bf16 %v3822_v50, %v275_v20 }
  0xb6   : > { %v3070_v54 = vcombine.low %v346_v29, %v354_v30 }
  0xb7   : > { %2321 = vmatpush1.bf16.msra.mxu1 %v3713_v32  ;;  %v350_v32 = vmax.bf16 %v3822_v50, %v286_v24  ;;  %v3804_v24 = vld [vmem:[%s4851_s1 + $0x3c4] ss:$8 sps:$4 sm:$0xff]  }
  0xb8   : > { %2613 = vmatpush1.bf16.msra.mxu0 %v3716_v33  ;;  %2322 = vmatprep.subr.bf16.mxu1 %v3721_v34  ;;  %v3054_v33 = vcombine.low %v330_v9, %v338_v10  ;;  %v3046_v34 = vcombine.low %v326_v11, %v334_v12  ;;  %v259_v9 = vld [vmem:[%s3998_s12 + $0xf8] sm:$0xff] }
  0xb9   : > { %2614 = vmatprep.subr.bf16.mxu0 %v3724_v35  ;;  %v3761_v35 = vld [vmem:[%s4851_s1 + $0x340] ss:$8 sps:$4 sm:$0xff]   ;;  %v3062_v55 = vcombine.low %v342_v31, %v350_v32  ;;  %v3791_v10 = vld [vmem:[%s4851_s1 + $0x390] ss:$8 sps:$4 sm:$0xff]   ;;  %v323_v12 = vmax.bf16 %v3822_v50, %v259_v9 }
  0xbb   : > { %2323 = vmatpush1.bf16.msra.mxu1 %v3719_v36  ;;  %v3764_v36 = vld [vmem:[%s4851_s1 + $0x740] ss:$8 sps:$4 sm:$0xff]  }
  0xbc   : > { %2615 = vmatpush1.bf16.msra.mxu0 %v3722_v37  ;;  %2324 = vmatprep.subr.bf16.mxu1 %v3727_v38  ;;  %v3769_v37 = vld [vmem:[%s4851_s1 + $0x354] ss:$8 sps:$4 sm:$0xff]  }
  0xbd   : > { %2616 = vmatprep.subr.bf16.mxu0 %v3730_v39  ;;  %v3772_v38 = vld [vmem:[%s4851_s1 + $0x754] ss:$8 sps:$4 sm:$0xff]   ;;  %v3071_v39 = vcombine.high %v346_v29, %v354_v30 }
  0xbe   : > { %v283_v29 = vld [vmem:[%s3998_s12 + $0x1b8] sm:$0xff] }
  0xbf   : > { %2325 = vmatpush1.bf16.msra.mxu1 %v3725_v40  ;;  %v235_v40 = vld [vmem:[%s3998_s12 + $0x38] sm:$0xff] }
  0xc0   : > { %2617 = vmatpush1.bf16.msra.mxu0 %v3728_v41  ;;  %2326 = vmatprep.subr.bf16.mxu1 %v3733_v42  ;;  %v3063_v41 = vcombine.high %v342_v31, %v350_v32  ;;  %v243_v42 = vld [vmem:[%s3998_s12 + $0x78] sm:$0xff]  ;;  %v347_v32 = vmax.bf16 %v3822_v50, %v283_v29 }
  0xc1   : > { %2618 = vmatprep.subr.bf16.mxu0 %v3736_v43  ;;  %v231_v43 = vld [vmem:[%s3998_s12 + $0x18] sm:$0xff] }
  0xc2   : > { %v291_v30 = vld [vmem:[%s3998_s12 + $0x1f8] sm:$0xff] }
  0xc3   : > { %2327 = vmatpush1.bf16.msra.mxu1 %v3731_v48  ;;  %v3778_v48 = vld [vmem:[%s4851_s1 + $0x764] ss:$8 sps:$4 sm:$0xff]   ;;  %v3805_v31 = vld [vmem:[%s4851_s1 + $0x3d0] ss:$8 sps:$4 sm:$0xff]  }
  0xc4   : > { %2619 = vmatpush1.bf16.msra.mxu0 %v3734_v49  ;;  %2369 = vmatprep.subr.bf16.mxu1 %v3739_v51  ;;  %v299_v49 = vmax.bf16 %v3822_v50, %v235_v40  ;;  %v307_v51 = vmax.bf16 %v3822_v50, %v243_v42  ;;  %v255_v40 = vld [vmem:[%s3998_s12 + $0xd8] sm:$0xff] }
  0xc5   : > { %2661 = vmatprep.subr.bf16.mxu0 %v3742_v52  ;;  %v4657_v52 = vmax.bf16 %v3822_v50, %v231_v43  ;;  %v319_v43 = vmax.bf16 %v3822_v50, %v255_v40 }
  0xc6   : > { %2329 = vmatmul.mubr.bf16.vlgmr.msra.gmra.mrb[0].mxu1 %v3014_v57  ;;  %v3776_v57 = vld [vmem:[%s4851_s1 + $0x760] ss:$8 sps:$4 sm:$0xff]  }
  0xc7   : > { %2621 = vmatmul.mubr.bf16.vlgmr.msra.gmra.mrb[0].mxu0 %v3022_v58  ;;  %2370 = vmatpush1.bf16.msra.mxu1 %v3737_v59  ;;  %v3781_v58 = vld [vmem:[%s4851_s1 + $0x374] ss:$8 sps:$4 sm:$0xff]   ;;  %v3016_v44 = vcombine.low %v4657_v52, %v4660_v53 }
  0xc8   : > { %2662 = vmatpush1.bf16.msra.mxu0 %v3740_v60  ;;  %2371 = vmatprep.subr.bf16.mxu1 %v3745_v61  ;;  %v3784_v59 = vld [vmem:[%s4851_s1 + $0x774] ss:$8 sps:$4 sm:$0xff]   ;;  %v3025_v60 = vcombine.high %v299_v49, %v307_v51  ;;  %v3017_v61 = vcombine.high %v4657_v52, %v4660_v53 }
  0xc9   : > { %2663 = vmatprep.subr.bf16.mxu0 %v3748_v62  ;;  %2630 = vmatprep.mubr.bf16.mxu0 %v3039_v63  ;;  %v3779_v62 = vld [vmem:[%s4851_s1 + $0x370] ss:$8 sps:$4 sm:$0xff]  }
  0xca   : > { %2338 = vmatprep.mubr.bf16.mxu1 %v3031_v1  ;;  %v3782_v63 = vld [vmem:[%s4851_s1 + $0x770] ss:$8 sps:$4 sm:$0xff]   ;;  %v3790_v1 = vld [vmem:[%s4851_s1 + $0x784] ss:$8 sps:$4 sm:$0xff]  }
  0xcb   : > { %2372 = vmatpush1.bf16.msra.mxu1 %v3743_v5  ;;  %v3793_v5 = vld [vmem:[%s4851_s1 + $0x394] ss:$8 sps:$4 sm:$0xff]  }
  0xcc   : > { %2664 = vmatpush1.bf16.msra.mxu0 %v3746_v6  ;;  %2373 = vmatprep.subr.bf16.mxu1 %v3751_v7  ;;  %v3317_v6 = vcombine.high %v598_v2, %v598_v2  ;;  %v3316_v7 = vcombine.low %v598_v2, %v598_v2 }
  0xcd   : > { %2665 = vmatprep.subr.bf16.mxu0 %v3754_v8  ;;  %v251_v8 = vld [vmem:[%s3998_s12 + $0xb8] sm:$0xff] }
  0xce   : > { %2339 = vmatmul.mubr.bf16.gmra.mrb[4].mxu1 %v3030_v14  ;;  %v315_v11 = vmax.bf16 %v3822_v50, %v251_v8  ;;  %v3798_v14 = vld [vmem:[%s4851_s1 + $0x3a4] ss:$8 sps:$4 sm:$0xff]  }
  0xcf   : > { %2631 = vmatmul.mubr.bf16.gmra.mrb[4].mxu0 %v3038_v13  ;;  %2374 = vmatpush1.bf16.msra.mxu1 %v3749_v15  ;;  %v2145_v13 = vsel %vm2143_vm1, %v3316_v7, 0  ;;  %v3024_v15 = vcombine.low %v299_v49, %v307_v51 }
  0xd0   : > { %2666 = vmatpush1.bf16.msra.mxu0 %v3752_v16  ;;  %2375 = vmatprep.subr.bf16.mxu1 %v3757_v17  ;;  %v3796_v16 = vld [vmem:[%s4851_s1 + $0x3a0] ss:$8 sps:$4 sm:$0xff]   ;;  %v3041_v17 = vcombine.high %v315_v11, %v323_v12 }
  0xd1   : > { %2667 = vmatprep.subr.bf16.mxu0 %v3760_v18  ;;  %2640 = vmatprep.mubr.bf16.mxu0 %v3055_v19  ;;  %v3801_v18 = vld [vmem:[%s4851_s1 + $0x3b4] ss:$8 sps:$4 sm:$0xff]  }
  0xd2   : > { %2348 = vmatprep.mubr.bf16.mxu1 %v3047_v21  ;;  %v267_v19 = vld [vmem:[%s3998_s12 + $0x138] sm:$0xff] }
  0xd3   : > { %2376 = vmatpush1.bf16.msra.mxu1 %v3755_v25  ;;  %v3799_v21 = vld [vmem:[%s4851_s1 + $0x3b0] ss:$8 sps:$4 sm:$0xff]   ;;  %v331_v22 = vmax.bf16 %v3822_v50, %v267_v19  ;;  %v3040_v25 = vcombine.low %v315_v11, %v323_v12 }
  0xd4   : > { %2668 = vmatpush1.bf16.msra.mxu0 %v3758_v26  ;;  %2377 = vmatprep.subr.bf16.mxu1 %v3763_v27  ;;  %v3802_v26 = vld [vmem:[%s4851_s1 + $0x3c0] ss:$8 sps:$4 sm:$0xff]  }
  0xd5   : > { %2669 = vmatprep.subr.bf16.mxu0 %v3766_v28  ;;  %v3057_v27 = vcombine.high %v331_v22, %v339_v23  ;;  %v3807_v28 = vld [vmem:[%s4851_s1 + $0x3d4] ss:$8 sps:$4 sm:$0xff]  }
  0xd6   : > { %2349 = vmatmul.mubr.bf16.gmra.mrb[8].mxu1 %v3046_v34  ;;  %v3810_v34 = vld [vmem:[%s4851_s1 + $0x3e4] ss:$8 sps:$4 sm:$0xff]  }
  0xd7   : > { %2641 = vmatmul.mubr.bf16.gmra.mrb[8].mxu0 %v3054_v33  ;;  %2378 = vmatpush1.bf16.msra.mxu1 %v3761_v35  ;;  %v355_v33 = vmax.bf16 %v3822_v50, %v291_v30  ;;  %v3056_v35 = vcombine.low %v331_v22, %v339_v23 }
  0xd8   : > { %2670 = vmatpush1.bf16.msra.mxu0 %v3764_v36  ;;  %2379 = vmatprep.subr.bf16.mxu1 %v3769_v37  ;;  %v3808_v36 = vld [vmem:[%s4851_s1 + $0x3e0] ss:$8 sps:$4 sm:$0xff]  }
  0xd9   : > { %2671 = vmatprep.subr.bf16.mxu0 %v3772_v38  ;;  %2650 = vmatprep.mubr.bf16.mxu0 %v3071_v39  ;;  %v3073_v37 = vcombine.high %v347_v32, %v355_v33  ;;  %v3813_v38 = vld [vmem:[%s4851_s1 + $0x3f4] ss:$8 sps:$4 sm:$0xff]  }
  0xda   : > { %2358 = vmatprep.mubr.bf16.mxu1 %v3063_v41  ;;  %v247_v39 = vld [vmem:[%s3998_s12 + $0x98] sm:$0xff] }
  0xdb   : > { %2380 = vmatpush1.bf16.msra.mxu1 %v3767_v45  ;;  %v3811_v41 = vld [vmem:[%s4851_s1 + $0x3f0] ss:$8 sps:$4 sm:$0xff]   ;;  %v311_v42 = vmax.bf16 %v3822_v50, %v247_v39  ;;  %v3072_v45 = vcombine.low %v347_v32, %v355_v33 }
  0xdc   : > { %2672 = vmatpush1.bf16.msra.mxu0 %v3770_v46  ;;  %2381 = vmatprep.subr.bf16.mxu1 %v3775_v47  ;;  %v263_v47 = vld [vmem:[%s3998_s12 + $0x118] sm:$0xff] }
  0xdd   : > { %2673 = vmatprep.subr.bf16.mxu0 %v3778_v48  ;;  %v3033_v46 = vcombine.high %v311_v42, %v319_v43  ;;  %v271_v48 = vld [vmem:[%s3998_s12 + $0x158] sm:$0xff]  ;;  %v327_v49 = vmax.bf16 %v3822_v50, %v263_v47 }
  0xde   : > { %2359 = vmatmul.mubr.bf16.gmra.mrb[12].mxu1 %v3062_v55  ;;  %v335_v51 = vmax.bf16 %v3822_v50, %v271_v48 }
  0xdf   : > { %2651 = vmatmul.mubr.bf16.gmra.mrb[12].mxu0 %v3070_v54  ;;  %2382 = vmatpush1.bf16.msra.mxu1 %v3773_v56  ;;  %v3032_v54 = vcombine.low %v311_v42, %v319_v43  ;;  %v279_v56 = vld [vmem:[%s3998_s12 + $0x198] sm:$0xff] }
  0xe0   : > { %2674 = vmatpush1.bf16.msra.mxu0 %v3776_v57  ;;  %2383 = vmatprep.subr.bf16.mxu1 %v3781_v58  ;;  %v3049_v55 = vcombine.high %v327_v49, %v335_v51  ;;  %v287_v57 = vld [vmem:[%s3998_s12 + $0x1d8] sm:$0xff]  ;;  %v343_v52 = vmax.bf16 %v3822_v50, %v279_v56  ;;  %v3048_v58 = vcombine.low %v327_v49, %v335_v51  ;;  %s3326_s12 = sshll.u32 %s4856_s29, 4  ;;  %s3008_s29 = sshll.u32 %s4858_s16, 1 }
  0xe1   : > { %2675 = vmatprep.subr.bf16.mxu0 %v3784_v59  ;;  %3319 = vmatprep.mubr.msk.bf16.mxu0 %vm2130_vm0, %v3025_v60  ;;  %v351_v53 = vmax.bf16 %v3822_v50, %v287_v57  ;;  %s4781_s19 = scalar_lea.vmem %s4852_s2, %s3326_s12  ;;  %s222_s22 = scalar_lea.vmem %s4853_s3, %s3008_s29 }
  0xe2   : > { %2401 = vmatprep.mubr.bf16.mxu1 %v3017_v61  ;;  %s226_s25 = scalar_lea.vmem %s4854_s4, %s3008_s29 }
  0xe3   : > { %2384 = vmatpush1.bf16.msra.mxu1 %v3779_v62  ;;  %v3065_v59 = vcombine.high %v343_v52, %v351_v53  ;;  %v3064_v60 = vcombine.low %v343_v52, %v351_v53 }
  0xe4   : > { %2676 = vmatpush1.bf16.msra.mxu0 %v3782_v63  ;;  %2385 = vmatprep.subr.bf16.mxu1 %v3787_v0 }
  0xe5   : > { %2677 = vmatprep.subr.bf16.mxu0 %v3790_v1 }
  0xe7   : > { %2386 = vmatpush1.bf16.msra.mxu1 %v3785_v3 }
  0xe8   : > { %2678 = vmatpush1.bf16.msra.mxu0 %v3788_v4  ;;  %2387 = vmatprep.subr.bf16.mxu1 %v3793_v5 }
  0xe9   : > { %3318 = vmatprep.subr.msk.bf16.mxu0 %vm2143_vm1, %v3317_v6 }
  0xeb   : > { %2388 = vmatpush1.bf16.msra.mxu1 %v3791_v10 }
  0xec   : > { %2680 = vmatpush1.bf16.msra.mxu0 %v2145_v13  ;;  %2389 = vmatprep.subr.bf16.mxu1 %v3798_v14 }
  0xef   : > { %2694 = vmatmul.mubr.bf16.vlgmr.msra.gmra.mrb[0].mxu0 %v3024_v15  ;;  %2390 = vmatpush1.bf16.msra.mxu1 %v3796_v16 }
  0xf0   : > { %3320 = vmatprep.mubr.msk.bf16.mxu0 %vm2130_vm0, %v3041_v17  ;;  %2391 = vmatprep.subr.bf16.mxu1 %v3801_v18 }
  0xf3   : > { %2392 = vmatpush1.bf16.msra.mxu1 %v3799_v21 }
  0xf4   : > { %2393 = vmatprep.subr.bf16.mxu1 %v3804_v24 }
  0xf7   : > { %2704 = vmatmul.mubr.bf16.gmra.mrb[4].mxu0 %v3040_v25  ;;  %2394 = vmatpush1.bf16.msra.mxu1 %v3802_v26 }
  0xf8   : > { %3321 = vmatprep.mubr.msk.bf16.mxu0 %vm2130_vm0, %v3057_v27  ;;  %2395 = vmatprep.subr.bf16.mxu1 %v3807_v28 }
  0xfb   : > { %2396 = vmatpush1.bf16.msra.mxu1 %v3805_v31 }
  0xfc   : > { %2397 = vmatprep.subr.bf16.mxu1 %v3810_v34 }
  0xff   : > { %2714 = vmatmul.mubr.bf16.gmra.mrb[8].mxu0 %v3056_v35  ;;  %2398 = vmatpush1.bf16.msra.mxu1 %v3808_v36 }
 0x100   : > { %3322 = vmatprep.mubr.msk.bf16.mxu0 %vm2130_vm0, %v3073_v37  ;;  %2399 = vmatprep.subr.bf16.mxu1 %v3813_v38 }
 0x103   : > { %2400 = vmatpush1.bf16.msra.mxu1 %v3811_v41 }
 0x106   : > { %2402 = vmatmul.mubr.bf16.vlgmr.msra.gmra.mrb[0].mxu1 %v3016_v44 }
 0x107   : > { %2724 = vmatmul.mubr.bf16.gmra.mrb[12].mxu0 %v3072_v45  ;;  %2411 = vmatprep.mubr.bf16.mxu1 %v3033_v46 }
 0x10e   : > { %2412 = vmatmul.mubr.bf16.gmra.mrb[4].mxu1 %v3032_v54 }
 0x10f   : > { %2421 = vmatprep.mubr.bf16.mxu1 %v3049_v55 }
 0x116   : > { %2422 = vmatmul.mubr.bf16.gmra.mrb[8].mxu1 %v3048_v58 }
 0x117   : > { %2431 = vmatprep.mubr.bf16.mxu1 %v3065_v59 }
 0x11e   : > { %2432 = vmatmul.mubr.bf16.gmra.mrb[12].mxu1 %v3064_v60 }
 0x1c2   : > { %v2695_v61 = vpop.f32.mrb[0].mxu0 }
 0x1c3   : > { %v2697_v62 = vpop.f32.mrb[1].mxu0 }
 0x1c4   : > { %v2699_v63 = vpop.f32.mrb[2].mxu0 }
 0x1c5   : > { %v2701_v0 = vpop.f32.mrb[3].mxu0 }
 0x1ca   : > { %v2705_v1 = vpop.f32.mrb[4].mxu0 }
 0x1cb   : > { %v2707_v2 = vpop.f32.mrb[5].mxu0 }
 0x1cc   : > { %v2709_v3 = vpop.f32.mrb[6].mxu0 }
 0x1cd   : > { %v2711_v4 = vpop.f32.mrb[7].mxu0 }
 0x1d2   : > { %v4769_v5 = vpop.f32.mrb[8].mxu0 }
 0x1d3   : > { %v4771_v6 = vpop.f32.mrb[9].mxu0 }
 0x1d4   : > { %v4773_v50 = vpop.f32.mrb[10].mxu0 }
 0x1d5   : > { %v4775_v7 = vpop.f32.mrb[11].mxu0 }
 0x1d9   : > { %v2403_v8 = vpop.f32.mrb[0].mxu1 }
 0x1da   : > { %v4783_v9 = vpop.f32.mrb[12].mxu0  ;;  %v3327_v10 = vadd.f32 %v2695_v61, %v2403_v8  ;;  %v2405_v11 = vpop.f32.mrb[1].mxu1 }
 0x1db   : > { %v4785_v12 = vpop.f32.mrb[13].mxu0  ;;  %v3328_v13 = vadd.f32 %v2697_v62, %v2405_v11  ;;  %v2407_v14 = vpop.f32.mrb[2].mxu1 }
 0x1dc   : > { %v4787_v15 = vpop.f32.mrb[14].mxu0  ;;  %2734 = vst [vmem:[%s4781_s19] sm:$0xff] %v3327_v10  ;;  %v3329_v16 = vadd.f32 %v2699_v63, %v2407_v14  ;;  %v2409_v17 = vpop.f32.mrb[3].mxu1  ;;  %v2808_v21 = vmul.f32 %v3327_v10, %v3327_v10 }
 0x1dd   : > { %v4790_v18 = vpop.f32.mrb[15].mxu0  ;;  %2736 = vst.msk [vmem:[%s4781_s19 + $0x8] sm:$0xff] %vm2735_vm2, %v3328_v13  ;;  %v2809_v19 = vmul.f32 %v3328_v13, %v3328_v13  ;;  %v3330_v20 = vadd.f32 %v2701_v0, %v2409_v17  ;;  %v2764_v24 = vsel %vm2735_vm2, %v3328_v13, 0.0 }
 0x1de   : > { %2737 = vst [vmem:[%s4781_s19 + $0x10] sm:$0xff] %v3329_v16  ;;  %v2751_v22 = vadd.f32 %v3329_v16, %v3327_v10  ;;  %v2810_v23 = vmul.f32 %v3329_v16, %v3329_v16 }
 0x1df   : > { %2738 = vst.msk [vmem:[%s4781_s19 + $0x18] sm:$0xff] %vm2735_vm2, %v3330_v20  ;;  %v2765_v25 = vsel %vm2735_vm2, %v3330_v20, 0.0  ;;  %v2811_v26 = vmul.f32 %v3330_v20, %v3330_v20  ;;  %v2837_v29 = vsel %vm2735_vm2, %v2809_v19, 0.0 }
 0x1e0   : > { %v2824_v27 = vadd.f32 %v2810_v23, %v2808_v21  ;;  %v2766_v28 = vadd.f32 %v2765_v25, %v2764_v24 }
 0x1e1   : > { %v2838_v30 = vsel %vm2735_vm2, %v2811_v26, 0.0  ;;  %v2413_v31 = vpop.f32.mrb[4].mxu1 }
 0x1e2   : > { %v2839_v32 = vadd.f32 %v2838_v30, %v2837_v29  ;;  %v3331_v33 = vadd.f32 %v2705_v1, %v2413_v31  ;;  %v2415_v34 = vpop.f32.mrb[5].mxu1 }
 0x1e3   : > { %v3332_v35 = vadd.f32 %v2707_v2, %v2415_v34  ;;  %v2417_v36 = vpop.f32.mrb[6].mxu1 }
 0x1e4   : > { %2739 = vst [vmem:[%s4781_s19 + $0x20] sm:$0xff] %v3331_v33  ;;  %v2752_v37 = vadd.f32 %v3331_v33, %v2751_v22  ;;  %v2812_v38 = vmul.f32 %v3331_v33, %v3331_v33  ;;  %v3333_v39 = vadd.f32 %v2709_v3, %v2417_v36  ;;  %v2419_v40 = vpop.f32.mrb[7].mxu1 }
 0x1e5   : > { %2740 = vst.msk [vmem:[%s4781_s19 + $0x28] sm:$0xff] %vm2735_vm2, %v3332_v35  ;;  %v2767_v41 = vsel %vm2735_vm2, %v3332_v35, 0.0  ;;  %v2813_v42 = vmul.f32 %v3332_v35, %v3332_v35  ;;  %v3334_v43 = vadd.f32 %v2711_v4, %v2419_v40 }
 0x1e6   : > { %v2825_v44 = vadd.f32 %v2824_v27, %v2812_v38  ;;  %v2768_v45 = vadd.f32 %v2767_v41, %v2766_v28  ;;  %2741 = vst [vmem:[%s4781_s19 + $0x30] sm:$0xff] %v3333_v39  ;;  %v2753_v46 = vadd.f32 %v3333_v39, %v2752_v37  ;;  %v2814_v47 = vmul.f32 %v3333_v39, %v3333_v39 }
 0x1e7   : > { %v2840_v48 = vsel %vm2735_vm2, %v2813_v42, 0.0  ;;  %2742 = vst.msk [vmem:[%s4781_s19 + $0x38] sm:$0xff] %vm2735_vm2, %v3334_v43  ;;  %v2769_v49 = vsel %vm2735_vm2, %v3334_v43, 0.0  ;;  %v2815_v51 = vmul.f32 %v3334_v43, %v3334_v43 }
 0x1e8   : > { %v2841_v54 = vadd.f32 %v2840_v48, %v2839_v32  ;;  %v2826_v55 = vadd.f32 %v2825_v44, %v2814_v47  ;;  %v2770_v56 = vadd.f32 %v2769_v49, %v2768_v45  ;;  %v3823_v44 = vmov 1966171168  }
 0x1e9   : > { %v2842_v57 = vsel %vm2735_vm2, %v2815_v51, 0.0  ;;  %v2423_v52 = vpop.f32.mrb[8].mxu1  ;;  %v2789_v45 = vunpack.c.l.s4 %v3823_v44 }
 0x1ea   : > { %v2843_v53 = vadd.f32 %v2842_v57, %v2841_v54  ;;  %v3335_v58 = vadd.f32 %v4769_v5, %v2423_v52  ;;  %v2425_v59 = vpop.f32.mrb[9].mxu1 }
 0x1eb   : > { %v3336_v60 = vadd.f32 %v4771_v6, %v2425_v59  ;;  %v2427_v61 = vpop.f32.mrb[10].mxu1  ;;  %v2790_v52 = vunpack.c.0.s8 %v2789_v45 }
 0x1ec   : > { %2743 = vst [vmem:[%s4781_s19 + $0x40] sm:$0xff] %v3335_v58  ;;  %v2754_v62 = vadd.f32 %v3335_v58, %v2753_v46  ;;  %v2816_v63 = vmul.f32 %v3335_v58, %v3335_v58  ;;  %v3337_v0 = vadd.f32 %v4773_v50, %v2427_v61  ;;  %v2429_v1 = vpop.f32.mrb[11].mxu1  ;;  %v2791_v46 = vlaneseq }
 0x1ed   : > { %2744 = vst.msk [vmem:[%s4781_s19 + $0x48] sm:$0xff] %vm2735_vm2, %v3336_v60  ;;  %v2771_v2 = vsel %vm2735_vm2, %v3336_v60, 0.0  ;;  %v2817_v3 = vmul.f32 %v3336_v60, %v3336_v60  ;;  %v3338_v4 = vadd.f32 %v4775_v7, %v2429_v1 }
 0x1ee   : > { %v2827_v8 = vadd.f32 %v2826_v55, %v2816_v63  ;;  %v2772_v5 = vadd.f32 %v2771_v2, %v2770_v56  ;;  %2745 = vst [vmem:[%s4781_s19 + $0x50] sm:$0xff] %v3337_v0  ;;  %v2755_v10 = vadd.f32 %v3337_v0, %v2754_v62  ;;  %v2818_v6 = vmul.f32 %v3337_v0, %v3337_v0 }
 0x1ef   : > { %v2844_v11 = vsel %vm2735_vm2, %v2817_v3, 0.0  ;;  %2746 = vst.msk [vmem:[%s4781_s19 + $0x58] sm:$0xff] %vm2735_vm2, %v3338_v4  ;;  %v2773_v50 = vsel %vm2735_vm2, %v3338_v4, 0.0  ;;  %v2819_v13 = vmul.f32 %v3338_v4, %v3338_v4  ;;  %vm2805_vm3 = vcmp.lt.s32.totalorder %v2791_v46, 216 }
 0x1f0   : > { %v2845_v14 = vadd.f32 %v2844_v11, %v2843_v53  ;;  %v2828_v16 = vadd.f32 %v2827_v8, %v2818_v6  ;;  %v2774_v17 = vadd.f32 %v2773_v50, %v2772_v5  ;;  %v2792_v53 = vshrl.u32 %v2791_v46, 7 }
 0x1f1   : > { %v2846_v19 = vsel %vm2735_vm2, %v2819_v13, 0.0  ;;  %v2433_v7 = vpop.f32.mrb[12].mxu1 }
 0x1f2   : > { %v2847_v20 = vadd.f32 %v2846_v19, %v2845_v14  ;;  %v3339_v21 = vadd.f32 %v4783_v9, %v2433_v7  ;;  %v2435_v22 = vpop.f32.mrb[13].mxu1  ;;  %v2793_v3 = vsub.s32 %v2790_v52, %v2792_v53 }
 0x1f3   : > { %v3340_v23 = vadd.f32 %v4785_v12, %v2435_v22  ;;  %v2437_v24 = vpop.f32.mrb[14].mxu1 }
 0x1f4   : > { %2747 = vst [vmem:[%s4781_s19 + $0x60] sm:$0xff] %v3339_v21  ;;  %v2756_v25 = vadd.f32 %v3339_v21, %v2755_v10  ;;  %v2820_v26 = vmul.f32 %v3339_v21, %v3339_v21  ;;  %v3341_v27 = vadd.f32 %v4787_v15, %v2437_v24  ;;  %v2439_v28 = vpop.f32.mrb[15].mxu1 }
 0x1f5   : > { %2748 = vst.msk [vmem:[%s4781_s19 + $0x68] sm:$0xff] %vm2735_vm2, %v3340_v23  ;;  %v2775_v29 = vsel %vm2735_vm2, %v3340_v23, 0.0  ;;  %v2821_v30 = vmul.f32 %v3340_v23, %v3340_v23  ;;  %v3342_v31 = vadd.f32 %v4790_v18, %v2439_v28 }
 0x1f6   : > { %v2829_v32 = vadd.f32 %v2828_v16, %v2820_v26  ;;  %v2776_v9 = vadd.f32 %v2775_v29, %v2774_v17  ;;  %2749 = vst [vmem:[%s4781_s19 + $0x70] sm:$0xff] %v3341_v27  ;;  %v2757_v33 = vadd.f32 %v3341_v27, %v2756_v25  ;;  %v2822_v12 = vmul.f32 %v3341_v27, %v3341_v27 }
 0x1f7   : > { %v2848_v34 = vsel %vm2735_vm2, %v2821_v30, 0.0  ;;  %2750 = vst.msk [vmem:[%s4781_s19 + $0x78] sm:$0xff] %vm2735_vm2, %v3342_v31  ;;  %v2777_v35 = vsel %vm2735_vm2, %v3342_v31, 0.0  ;;  %v2823_v15 = vmul.f32 %v3342_v31, %v3342_v31 }
 0x1f8   : > { %v2849_v36 = vadd.f32 %v2848_v34, %v2847_v20  ;;  %v2758_v37 = vrot.slane %v2757_v33, 4  ;;  %v2830_v38 = vadd.f32 %v2829_v32, %v2822_v12  ;;  %v2778_v39 = vadd.f32 %v2777_v35, %v2776_v9 }
 0x1f9   : > { %v2850_v40 = vsel %vm2735_vm2, %v2823_v15, 0.0 }
 0x1fa   : > { %v2759_v18 = vadd.f32 %v2758_v37, %v2757_v33  ;;  %v2831_v41 = vrot.slane %v2830_v38, 4  ;;  %v2779_v42 = vrot.slane %v2778_v39, 4  ;;  %v2851_v43 = vadd.f32 %v2850_v40, %v2849_v36 }
 0x1fc   : > { %v2760_v47 = vrot.slane %v2759_v18, 2  ;;  %v2832_v48 = vadd.f32 %v2831_v41, %v2830_v38  ;;  %v2780_v49 = vadd.f32 %v2779_v42, %v2778_v39  ;;  %v2852_v51 = vrot.slane %v2851_v43, 4 }
 0x1fe   : > { %v2761_v54 = vadd.f32 %v2760_v47, %v2759_v18  ;;  %v2833_v55 = vrot.slane %v2832_v48, 2  ;;  %v2781_v56 = vrot.slane %v2780_v49, 2  ;;  %v2853_v57 = vadd.f32 %v2852_v51, %v2851_v43 }
 0x200   : > { %v2762_v58 = vrot.slane %v2761_v54, 1  ;;  %v2834_v59 = vadd.f32 %v2833_v55, %v2832_v48  ;;  %v2782_v60 = vadd.f32 %v2781_v56, %v2780_v49  ;;  %v2854_v61 = vrot.slane %v2853_v57, 2 }
 0x202   : > { %v2835_v62 = vrot.slane %v2834_v59, 1  ;;  %v2783_v63 = vrot.slane %v2782_v60, 1  ;;  %v2855_v0 = vadd.f32 %v2854_v61, %v2853_v57  ;;  %v2763_v1 = vadd.f32 %v2762_v58, %v2761_v54 }
 0x204   : > { %v2784_v2 = vadd.f32 %v2783_v63, %v2782_v60  ;;  %v2856_v4 = vrot.slane %v2855_v0, 1  ;;  %v2836_v8 = vadd.f32 %v2835_v62, %v2834_v59 }
 0x206   : > { %v2787_v5 = vcombine.low %v2763_v1, %v2784_v2  ;;  %v2857_v10 = vadd.f32 %v2856_v4, %v2855_v0 }
 0x208   : > { %v2794_v6 = vrot.slane %v2787_v5, %v2793_v3  ;;  %v2860_v11 = vcombine.low %v2836_v8, %v2857_v10 }
 0x20a   : > { %v2801_v50 = vrot.slane %v2794_v6, %v2793_v3  ;;  %v2867_v13 = vrot.slane %v2860_v11, %v2793_v3 }
 0x20c   : > { %2807 = vst.msk [vmem:[%s222_s22] sm:$0x3] %vm2805_vm3, %v2801_v50  ;;  %v2874_v14 = vrot.slane %v2867_v13, %v2793_v3 }
 0x20e   : > { %2876 = vst.msk [vmem:[%s226_s25] sm:$0x3] %vm2805_vm3, %v2874_v14 }
 0x20f PF: > { %s15_s15 = sadd.s32 1, %s3820_s15  }
 0x210   : > { %p12_p5 = scmp.ge.s32.totalorder %s15_s15, 4  }
 0x212   :  { %14 = sbr.rel (!%p12_p5) target bundleno = 1 (0x1), region = 82 }

</bundles_post_ra>
